<compile_context>
chip_gen: v6e
topology: v6e:2x2x1
jax: 0.10.0
libtpu: 0.0.40
codegen_flags: <defaults>
</compile_context>

<pallas_src>
import functools

import jax
import jax.numpy as jnp
from jax.experimental import pallas as pl
from jax.experimental.pallas import tpu as pltpu


VMEM_LIMIT_BYTES = 32 * 1024 * 1024  # explicit scoped-VMEM budget (fits v5e/v6e/v7x)


def _round_up(x, m):
    return (x + m - 1) // m * m


def _choose_tiles(n, tm_max=512, tk_max=1024):
    """Pick row tile tm and contraction tile tk (multiples of 128) for node count n.

    For v7x keep an eye on n_pad // tm >= 2 so the 'parallel' row axis can be
    sharded across both TensorCores (demo N is too small for that to matter).
    """
    n_min = _round_up(n, 128)
    tm = min(tm_max, n_min)
    n_pad = _round_up(n, tm)
    tk = min(tk_max, n_pad)
    while n_pad % tk:
        tk -= 128
    return n_pad, tm, tk


# ----------------------------------------------------------------------------
# Kernel 1: one fused GCN layer.
#   new_embeds = adj @ embeds        (bf16 inputs, f32 accumulation, K-tiled)
#   new_total  = prev_total + new_embeds
# Outputs: new_embeds as bf16 (feeds the next layer's MXU), new_total as f32.
# ----------------------------------------------------------------------------
def gcn_layer_kernel(adj_ref, x_ref, prev_ref, emb_ref, tot_ref, acc_ref):
    k = pl.program_id(1)

    @pl.when(k == 0)
    def _():
        acc_ref[...] = jnp.zeros_like(acc_ref)

    acc_ref[...] += jnp.dot(adj_ref[...], x_ref[...],
                            preferred_element_type=jnp.float32)

    @pl.when(k == pl.num_programs(1) - 1)
    def _():
        new_embeds = acc_ref[...]
        emb_ref[...] = new_embeds.astype(emb_ref.dtype)
        tot_ref[...] = prev_ref[...] + new_embeds


def gcn_layer(adj_bf16, embeds_bf16, total, *, tm, tk):
    """One GCN propagation with fused running-sum accumulation.

    adj_bf16: (Np, Np) bf16, embeds_bf16: (Np, D) bf16, total: (Np, D) f32.
    Returns (new_embeds_bf16, new_total_f32).
    """
    n_pad, d = embeds_bf16.shape
    row_spec_f32 = pl.BlockSpec((tm, d), lambda i, k: (i, 0))
    new_embeds, new_total = pl.pallas_call(
        gcn_layer_kernel,
        out_shape=(jax.ShapeDtypeStruct((n_pad, d), jnp.bfloat16),
                   jax.ShapeDtypeStruct((n_pad, d), jnp.float32)),
        grid_spec=pltpu.PrefetchScalarGridSpec(
            num_scalar_prefetch=0,
            grid=(pl.cdiv(n_pad, tm), pl.cdiv(n_pad, tk)),
            in_specs=[
                pl.BlockSpec((tm, tk), lambda i, k: (i, k)),   # adj tile (bf16)
                pl.BlockSpec((tk, d), lambda i, k: (k, 0)),    # embeds K-slab (bf16)
                row_spec_f32,                                  # running total (f32)
            ],
            out_specs=(pl.BlockSpec((tm, d), lambda i, k: (i, 0)),   # new embeds (bf16)
                       pl.BlockSpec((tm, d), lambda i, k: (i, 0))),  # new total (f32)
            scratch_shapes=[pltpu.VMEM((tm, d), jnp.float32)],
        ),
        compiler_params=pltpu.CompilerParams(
            dimension_semantics=("parallel", "arbitrary"),
            vmem_limit_bytes=VMEM_LIMIT_BYTES),
    )(adj_bf16, embeds_bf16, total)
    return new_embeds, new_total


# ----------------------------------------------------------------------------
# Kernel 2: fused VGAE encoder head (mean/std branches packed).
#   h            = ReLU(x @ [w1m|w1s] + [b1m|b1s])             (tm, 2D)
#   [mean|std_p] = h @ blockdiag(w2m, w2s) + [b2m|b2s]          (tm, 2D)
#   std          = softplus(std_p)
#   out          = noise * std + mean
# Outputs: out, mean, std as three (tm, D) blocks.
# ----------------------------------------------------------------------------
def vgae_head_kernel(x_ref, w1_ref, b1_ref, w2_ref, b2_ref, noise_ref,
                     out_ref, mean_ref, std_ref):
    d = out_ref.shape[1]
    x = x_ref[...]

    h = jnp.dot(x, w1_ref[...], preferred_element_type=jnp.float32) + b1_ref[...]
    h = jnp.maximum(h, 0.0)

    ms = jnp.dot(h, w2_ref[...], preferred_element_type=jnp.float32) + b2_ref[...]
    mean = ms[:, :d]
    std = jnp.logaddexp(ms[:, d:], 0.0)          # softplus(x) = log(1 + exp(x))

    out_ref[...] = noise_ref[...] * std + mean
    mean_ref[...] = mean
    std_ref[...] = std


def vgae_head(x, w1_cat, b1_cat, w2_blk, b2_cat, noise, *, tm):
    n_pad, d = x.shape
    row_spec = pl.BlockSpec((tm, d), lambda i: (i, 0))
    out, mean, std = pl.pallas_call(
        vgae_head_kernel,
        out_shape=(jax.ShapeDtypeStruct((n_pad, d), jnp.float32),
                   jax.ShapeDtypeStruct((n_pad, d), jnp.float32),
                   jax.ShapeDtypeStruct((n_pad, d), jnp.float32)),
        grid_spec=pltpu.PrefetchScalarGridSpec(
            num_scalar_prefetch=0,
            grid=(pl.cdiv(n_pad, tm),),
            in_specs=[row_spec,                                        # x block
                      pl.BlockSpec((d, 2 * d), lambda i: (0, 0)),      # w1 cat
                      pl.BlockSpec((1, 2 * d), lambda i: (0, 0)),      # b1 cat
                      pl.BlockSpec((2 * d, 2 * d), lambda i: (0, 0)),  # w2 blockdiag
                      pl.BlockSpec((1, 2 * d), lambda i: (0, 0)),      # b2 cat
                      row_spec],                                       # noise block
            out_specs=(row_spec, row_spec, row_spec),
        ),
        compiler_params=pltpu.CompilerParams(
            dimension_semantics=("parallel",),
            vmem_limit_bytes=VMEM_LIMIT_BYTES),
    )(x, w1_cat, b1_cat, w2_blk, b2_cat, noise)
    return out, mean, std


# ----------------------------------------------------------------------------
# Model glue (plain JAX): parameter init + full forward.
# ----------------------------------------------------------------------------
def xavier_uniform(key, shape):
    fan_in, fan_out = shape[0], shape[1]
    limit = (6.0 / (fan_in + fan_out)) ** 0.5
    return jax.random.uniform(key, shape, jnp.float32, -limit, limit)


def init_params(key, n_user, n_item, latdim):
    keys = jax.random.split(key, 10)
    d = latdim
    return {
        "uEmbeds": xavier_uniform(keys[0], (n_user, d)),
        "iEmbeds": xavier_uniform(keys[1], (n_item, d)),
        # encoder_mean
        "w1m": xavier_uniform(keys[2], (d, d)),
        "b1m": 0.01 * jax.random.normal(keys[3], (1, d), jnp.float32),
        "w2m": xavier_uniform(keys[4], (d, d)),
        "b2m": 0.01 * jax.random.normal(keys[5], (1, d), jnp.float32),
        # encoder_std
        "w1s": xavier_uniform(keys[6], (d, d)),
        "b1s": 0.01 * jax.random.normal(keys[7], (1, d), jnp.float32),
        "w2s": xavier_uniform(keys[8], (d, d)),
        "b2s": 0.01 * jax.random.normal(keys[9], (1, d), jnp.float32),
    }


@functools.partial(jax.jit, static_argnames=("gnn_layer",))
def vgae_encoder_forward(params, adj, noise, gnn_layer=2):
    n = adj.shape[0]
    d = params["uEmbeds"].shape[1]
    n_pad, tm, tk = _choose_tiles(n)

    # Pad node axis to the tile grid; padded rows/cols are zero so they do not
    # perturb the matmul, and are sliced off at the end.
    ini = jnp.concatenate([params["uEmbeds"], params["iEmbeds"]], axis=0)
    ini = jnp.pad(ini, ((0, n_pad - n), (0, 0)))
    adj_bf16 = jnp.pad(adj, ((0, n_pad - n), (0, n_pad - n))).astype(jnp.bfloat16)
    noise_p = jnp.pad(noise, ((0, n_pad - n), (0, 0)))

    # forward_graphcl: sum of the initial embeds and every GCN layer output.
    embeds = ini.astype(jnp.bfloat16)   # single upfront cast; layers emit bf16
    total = ini
    for _ in range(gnn_layer):
        embeds, total = gcn_layer(adj_bf16, embeds, total, tm=tm, tk=tk)

    # Pack the head weights: first layers concatenated along output columns,
    # second layers block-diagonal so one MXU pass yields [mean | std_pre].
    zeros = jnp.zeros((d, d), jnp.float32)
    w1_cat = jnp.concatenate([params["w1m"], params["w1s"]], axis=1)
    b1_cat = jnp.concatenate([params["b1m"], params["b1s"]], axis=1)
    w2_blk = jnp.concatenate(
        [jnp.concatenate([params["w2m"], zeros], axis=1),
         jnp.concatenate([zeros, params["w2s"]], axis=1)], axis=0)
    b2_cat = jnp.concatenate([params["b2m"], params["b2s"]], axis=1)

    out, mean, std = vgae_head(total, w1_cat, b1_cat, w2_blk, b2_cat, noise_p,
                               tm=tm)
    return out[:n], mean[:n], std[:n]


# ----------------------------------------------------------------------------
# Reference (pure JAX, matching the kernel's bf16 spmm inputs) for sanity check.
# ----------------------------------------------------------------------------
def reference_forward(params, adj, noise, gnn_layer=2):
    ini = jnp.concatenate([params["uEmbeds"], params["iEmbeds"]], axis=0)
    e = ini
    total = ini
    adj_bf = adj.astype(jnp.bfloat16)
    for _ in range(gnn_layer):
        e = jnp.dot(adj_bf, e.astype(jnp.bfloat16),
                    preferred_element_type=jnp.float32)
        total = total + e
    h_m = jnp.maximum(total @ params["w1m"] + params["b1m"], 0.0)
    mean = h_m @ params["w2m"] + params["b2m"]
    h_s = jnp.maximum(total @ params["w1s"] + params["b1s"], 0.0)
    std = jax.nn.softplus(h_s @ params["w2s"] + params["b2s"])
    return noise * std + mean, mean, std


if __name__ == "__main__":
    # Small synthetic config (args.user, args.item, args.latdim, args.gnn_layer)
    n_user, n_item, latdim, gnn_layer = 48, 80, 32, 2
    N = n_user + n_item  # 128

    key = jax.random.PRNGKey(0)
    k_param, k_adj, k_noise = jax.random.split(key, 3)

    params = init_params(k_param, n_user, n_item, latdim)

    # Dense symmetric-normalized-ish adjacency (synthetic, deterministic).
    a = jax.random.uniform(k_adj, (N, N), jnp.float32)
    a = (a > 0.9).astype(jnp.float32)
    a = a + a.T + jnp.eye(N, dtype=jnp.float32)
    deg = jnp.maximum(a.sum(axis=1, keepdims=True), 1.0)
    adj = a / jnp.sqrt(deg) / jnp.sqrt(deg.T)

    # Gaussian noise for the reparameterization (torch.randn equivalent).
    noise = jax.random.normal(k_noise, (N, latdim), jnp.float32)

    out, x_mean, x_std = vgae_encoder_forward(params, adj, noise,
                                              gnn_layer=gnn_layer)
    jax.block_until_ready((out, x_mean, x_std))

    ref_out, ref_mean, ref_std = reference_forward(params, adj, noise,
                                                   gnn_layer=gnn_layer)
    assert jnp.allclose(out, ref_out, atol=2e-3, rtol=2e-3)
    assert jnp.allclose(x_mean, ref_mean, atol=2e-3, rtol=2e-3)
    assert jnp.allclose(x_std, ref_std, atol=2e-3, rtol=2e-3)

    print("KERNEL_OK")
</pallas_src>

<mosaic_0001>
module attributes {stable_mosaic.version = 11 : i64} {
  func.func @gcn_layer_kernel(%arg0: i32, %arg1: i32, %arg2: memref<128x128xbf16, #tpu.memory_space<vmem>>, %arg3: memref<128x32xbf16, #tpu.memory_space<vmem>>, %arg4: memref<128x32xf32, #tpu.memory_space<vmem>>, %arg5: memref<128x32xbf16, #tpu.memory_space<vmem>>, %arg6: memref<128x32xf32, #tpu.memory_space<vmem>>, %arg7: memref<128x32xf32, #tpu.memory_space<vmem>>) attributes {dimension_semantics = [#tpu.dimension_semantics<parallel>, #tpu.dimension_semantics<arbitrary>], iteration_bounds = array<i64: 1, 1>, scalar_prefetch = 0 : i64, scratch_operands = 1 : i64, tpu.core_type = #tpu.core_type<tc>, window_params = [{transform_indices = @transform_0, window_bounds = array<i64: 128, 128>}, {transform_indices = @transform_1, window_bounds = array<i64: 128, 32>}, {transform_indices = @transform_2, window_bounds = array<i64: 128, 32>}, {transform_indices = @transform_3, window_bounds = array<i64: 128, 32>}, {transform_indices = @transform_4, window_bounds = array<i64: 128, 32>}]} {
    %c0_i32 = arith.constant 0 : i32
    %0 = arith.cmpi eq, %arg1, %c0_i32 : i32
    %1 = arith.extui %0 : i1 to i32
    %c0_i32_0 = arith.constant 0 : i32
    %2 = arith.cmpi ne, %1, %c0_i32_0 : i32
    scf.if %2 {
      %cst_10 = arith.constant 0.000000e+00 : f32
      %12 = vector.broadcast %cst_10 : f32 to vector<128x32xf32>
      %c0_11 = arith.constant 0 : index
      %c0_12 = arith.constant 0 : index
      %13 = vector.load %arg7[%c0_11, %c0_12] : memref<128x32xf32, #tpu.memory_space<vmem>>, vector<128x32xf32>
      tpu.vector_store %arg7[%c0_11, %c0_12], %12 {strides = array<i32>} : memref<128x32xf32, #tpu.memory_space<vmem>>, vector<128x32xf32>,
    } else {
    }
    %c0 = arith.constant 0 : index
    %c0_1 = arith.constant 0 : index
    %3 = vector.load %arg7[%c0, %c0_1] : memref<128x32xf32, #tpu.memory_space<vmem>>, vector<128x32xf32>
    %c0_2 = arith.constant 0 : index
    %c0_3 = arith.constant 0 : index
    %4 = vector.load %arg2[%c0_2, %c0_3] : memref<128x128xbf16, #tpu.memory_space<vmem>>, vector<128x128xbf16>
    %c0_4 = arith.constant 0 : index
    %c0_5 = arith.constant 0 : index
    %5 = vector.load %arg3[%c0_4, %c0_5] : memref<128x32xbf16, #tpu.memory_space<vmem>>, vector<128x32xbf16>
    %cst = arith.constant dense<0.000000e+00> : vector<128x32xf32>
    %6 = tpu.matmul %4, %5, %cst {dimension_numbers = #tpu.dot_dimension_numbers<[1], [0], [0], [1], [0, 0, 1, 1], [], []>} : vector<128x128xbf16>, vector<128x32xbf16>, vector<128x32xf32> -> vector<128x32xf32>
    %7 = arith.addf %3, %6 : vector<128x32xf32>
    %c0_6 = arith.constant 0 : index
    %c0_7 = arith.constant 0 : index
    %8 = vector.load %arg7[%c0_6, %c0_7] : memref<128x32xf32, #tpu.memory_space<vmem>>, vector<128x32xf32>
    tpu.vector_store %arg7[%c0_6, %c0_7], %7 {strides = array<i32>} : memref<128x32xf32, #tpu.memory_space<vmem>>, vector<128x32xf32>,
    %c0_i32_8 = arith.constant 0 : i32
    %9 = arith.cmpi eq, %arg1, %c0_i32_8 : i32
    %10 = arith.extui %9 : i1 to i32
    %c0_i32_9 = arith.constant 0 : i32
    %11 = arith.cmpi ne, %10, %c0_i32_9 : i32
    scf.if %11 {
      %c0_10 = arith.constant 0 : index
      %c0_11 = arith.constant 0 : index
      %12 = vector.load %arg7[%c0_10, %c0_11] : memref<128x32xf32, #tpu.memory_space<vmem>>, vector<128x32xf32>
      %13 = arith.truncf %12 : vector<128x32xf32> to vector<128x32xbf16>
      %c0_12 = arith.constant 0 : index
      %c0_13 = arith.constant 0 : index
      %14 = vector.load %arg5[%c0_12, %c0_13] : memref<128x32xbf16, #tpu.memory_space<vmem>>, vector<128x32xbf16>
      tpu.vector_store %arg5[%c0_12, %c0_13], %13 {strides = array<i32>} : memref<128x32xbf16, #tpu.memory_space<vmem>>, vector<128x32xbf16>,
      %c0_14 = arith.constant 0 : index
      %c0_15 = arith.constant 0 : index
      %15 = vector.load %arg4[%c0_14, %c0_15] : memref<128x32xf32, #tpu.memory_space<vmem>>, vector<128x32xf32>
      %16 = arith.addf %15, %12 : vector<128x32xf32>
      %c0_16 = arith.constant 0 : index
      %c0_17 = arith.constant 0 : index
      %17 = vector.load %arg6[%c0_16, %c0_17] : memref<128x32xf32, #tpu.memory_space<vmem>>, vector<128x32xf32>
      tpu.vector_store %arg6[%c0_16, %c0_17], %16 {strides = array<i32>} : memref<128x32xf32, #tpu.memory_space<vmem>>, vector<128x32xf32>,
    } else {
    }
    return
  }
  func.func @transform_0(%arg0: i32, %arg1: i32) -> (i32, i32) {
    %c0_i32 = arith.constant 0 : i32
    return %arg0, %arg1 : i32, i32
  }
  func.func @transform_1(%arg0: i32, %arg1: i32) -> (i32, i32) {
    %c0_i32 = arith.constant 0 : i32
    %c0_i32_0 = arith.constant 0 : i32
    return %arg1, %c0_i32 : i32, i32
  }
  func.func @transform_2(%arg0: i32, %arg1: i32) -> (i32, i32) {
    %c0_i32 = arith.constant 0 : i32
    %c0_i32_0 = arith.constant 0 : i32
    return %arg0, %c0_i32 : i32, i32
  }
  func.func @transform_3(%arg0: i32, %arg1: i32) -> (i32, i32) {
    %c0_i32 = arith.constant 0 : i32
    %c0_i32_0 = arith.constant 0 : i32
    return %arg0, %c0_i32 : i32, i32
  }
  func.func @transform_4(%arg0: i32, %arg1: i32) -> (i32, i32) {
    %c0_i32 = arith.constant 0 : i32
    %c0_i32_0 = arith.constant 0 : i32
    return %arg0, %c0_i32 : i32, i32
  }
}

module attributes {stable_mosaic.version = 11 : i64} {
  func.func @vgae_head_kernel(%arg0: i32, %arg1: memref<128x32xf32, #tpu.memory_space<vmem>>, %arg2: memref<32x64xf32, #tpu.memory_space<vmem>>, %arg3: memref<1x64xf32, #tpu.memory_space<vmem>>, %arg4: memref<64x64xf32, #tpu.memory_space<vmem>>, %arg5: memref<1x64xf32, #tpu.memory_space<vmem>>, %arg6: memref<128x32xf32, #tpu.memory_space<vmem>>, %arg7: memref<128x32xf32, #tpu.memory_space<vmem>>, %arg8: memref<128x32xf32, #tpu.memory_space<vmem>>, %arg9: memref<128x32xf32, #tpu.memory_space<vmem>>) attributes {dimension_semantics = [#tpu.dimension_semantics<parallel>], iteration_bounds = array<i64: 1>, scalar_prefetch = 0 : i64, scratch_operands = 0 : i64, tpu.core_type = #tpu.core_type<tc>, window_params = [{transform_indices = @transform_0, window_bounds = array<i64: 128, 32>}, {pipeline_mode = #tpu.pipeline_mode<synchronous>, transform_indices = @transform_1, window_bounds = array<i64: 32, 64>}, {pipeline_mode = #tpu.pipeline_mode<synchronous>, transform_indices = @transform_2, window_bounds = array<i64: 1, 64>}, {pipeline_mode = #tpu.pipeline_mode<synchronous>, transform_indices = @transform_3, window_bounds = array<i64: 64, 64>}, {pipeline_mode = #tpu.pipeline_mode<synchronous>, transform_indices = @transform_4, window_bounds = array<i64: 1, 64>}, {transform_indices = @transform_5, window_bounds = array<i64: 128, 32>}, {transform_indices = @transform_6, window_bounds = array<i64: 128, 32>}, {transform_indices = @transform_7, window_bounds = array<i64: 128, 32>}, {transform_indices = @transform_8, window_bounds = array<i64: 128, 32>}]} {
    %c0 = arith.constant 0 : index
    %c0_0 = arith.constant 0 : index
    %0 = vector.load %arg1[%c0, %c0_0] : memref<128x32xf32, #tpu.memory_space<vmem>>, vector<128x32xf32>
    %c0_1 = arith.constant 0 : index
    %c0_2 = arith.constant 0 : index
    %1 = vector.load %arg2[%c0_1, %c0_2] : memref<32x64xf32, #tpu.memory_space<vmem>>, vector<32x64xf32>
    %cst = arith.constant dense<0.000000e+00> : vector<128x64xf32>
    %2 = tpu.matmul %0, %1, %cst {dimension_numbers = #tpu.dot_dimension_numbers<[1], [0], [0], [1], [0, 0, 1, 1], [], []>} : vector<128x32xf32>, vector<32x64xf32>, vector<128x64xf32> -> vector<128x64xf32>
    %c0_3 = arith.constant 0 : index
    %c0_4 = arith.constant 0 : index
    %3 = vector.load %arg3[%c0_3, %c0_4] : memref<1x64xf32, #tpu.memory_space<vmem>>, vector<1x64xf32>
    %4 = vector.broadcast %3 : vector<1x64xf32> to vector<128x64xf32>
    %5 = arith.addf %2, %4 : vector<128x64xf32>
    %cst_5 = arith.constant 0.000000e+00 : f32
    %6 = vector.broadcast %cst_5 : f32 to vector<128x64xf32>
    %7 = arith.maximumf %5, %6 : vector<128x64xf32>
    %c0_6 = arith.constant 0 : index
    %c0_7 = arith.constant 0 : index
    %8 = vector.load %arg4[%c0_6, %c0_7] : memref<64x64xf32, #tpu.memory_space<vmem>>, vector<64x64xf32>
    %cst_8 = arith.constant dense<0.000000e+00> : vector<128x64xf32>
    %9 = tpu.matmul %7, %8, %cst_8 {dimension_numbers = #tpu.dot_dimension_numbers<[1], [0], [0], [1], [0, 0, 1, 1], [], []>} : vector<128x64xf32>, vector<64x64xf32>, vector<128x64xf32> -> vector<128x64xf32>
    %c0_9 = arith.constant 0 : index
    %c0_10 = arith.constant 0 : index
    %10 = vector.load %arg5[%c0_9, %c0_10] : memref<1x64xf32, #tpu.memory_space<vmem>>, vector<1x64xf32>
    %11 = vector.broadcast %10 : vector<1x64xf32> to vector<128x64xf32>
    %12 = arith.addf %9, %11 : vector<128x64xf32>
    %13 = vector.extract_strided_slice %12 {offsets = [0, 0], sizes = [128, 32], strides = [1, 1]} : vector<128x64xf32> to vector<128x32xf32>
    %14 = vector.extract_strided_slice %12 {offsets = [0, 32], sizes = [128, 32], strides = [1, 1]} : vector<128x64xf32> to vector<128x32xf32>
    %cst_11 = arith.constant 0.000000e+00 : f32
    %15 = vector.broadcast %cst_11 : f32 to vector<128x32xf32>
    %16 = arith.maximumf %14, %15 : vector<128x32xf32>
    %17 = vector.broadcast %cst_11 : f32 to vector<128x32xf32>
    %18 = arith.subf %14, %17 : vector<128x32xf32>
    %19 = arith.cmpf one, %18, %18 : vector<128x32xf32>
    %20 = vector.broadcast %cst_11 : f32 to vector<128x32xf32>
    %21 = arith.addf %14, %20 : vector<128x32xf32>
    %22 = math.absf %18 : vector<128x32xf32>
    %cst_12 = arith.constant 0.000000e+00 : f32
    %23 = vector.broadcast %cst_12 : f32 to vector<128x32xf32>
    %24 = arith.subf %23, %22 : vector<128x32xf32>
    %25 = math.exp %24 : vector<128x32xf32>
    %26 = math.log1p %25 : vector<128x32xf32>
    %27 = arith.addf %16, %26 : vector<128x32xf32>
    %28 = arith.select %19, %21, %27 : vector<128x32xi1>, vector<128x32xf32>
    %c0_13 = arith.constant 0 : index
    %c0_14 = arith.constant 0 : index
    %29 = vector.load %arg6[%c0_13, %c0_14] : memref<128x32xf32, #tpu.memory_space<vmem>>, vector<128x32xf32>
    %30 = arith.mulf %29, %28 : vector<128x32xf32>
    %31 = arith.addf %30, %13 : vector<128x32xf32>
    %c0_15 = arith.constant 0 : index
    %c0_16 = arith.constant 0 : index
    %32 = vector.load %arg7[%c0_15, %c0_16] : memref<128x32xf32, #tpu.memory_space<vmem>>, vector<128x32xf32>
    tpu.vector_store %arg7[%c0_15, %c0_16], %31 {strides = array<i32>} : memref<128x32xf32, #tpu.memory_space<vmem>>, vector<128x32xf32>,
    %c0_17 = arith.constant 0 : index
    %c0_18 = arith.constant 0 : index
    %33 = vector.load %arg8[%c0_17, %c0_18] : memref<128x32xf32, #tpu.memory_space<vmem>>, vector<128x32xf32>
    tpu.vector_store %arg8[%c0_17, %c0_18], %13 {strides = array<i32>} : memref<128x32xf32, #tpu.memory_space<vmem>>, vector<128x32xf32>,
    %c0_19 = arith.constant 0 : index
    %c0_20 = arith.constant 0 : index
    %34 = vector.load %arg9[%c0_19, %c0_20] : memref<128x32xf32, #tpu.memory_space<vmem>>, vector<128x32xf32>
    tpu.vector_store %arg9[%c0_19, %c0_20], %28 {strides = array<i32>} : memref<128x32xf32, #tpu.memory_space<vmem>>, vector<128x32xf32>,
    return
  }
  func.func @transform_0(%arg0: i32) -> (i32, i32) {
    %c0_i32 = arith.constant 0 : i32
    %c0_i32_0 = arith.constant 0 : i32
    return %arg0, %c0_i32 : i32, i32
  }
  func.func @transform_1(%arg0: i32) -> (i32, i32) {
    %c0_i32 = arith.constant 0 : i32
    %c0_i32_0 = arith.constant 0 : i32
    %c0_i32_1 = arith.constant 0 : i32
    return %c0_i32, %c0_i32_0 : i32, i32
  }
  func.func @transform_2(%arg0: i32) -> (i32, i32) {
    %c0_i32 = arith.constant 0 : i32
    %c0_i32_0 = arith.constant 0 : i32
    %c0_i32_1 = arith.constant 0 : i32
    return %c0_i32, %c0_i32_0 : i32, i32
  }
  func.func @transform_3(%arg0: i32) -> (i32, i32) {
    %c0_i32 = arith.constant 0 : i32
    %c0_i32_0 = arith.constant 0 : i32
    %c0_i32_1 = arith.constant 0 : i32
    return %c0_i32, %c0_i32_0 : i32, i32
  }
  func.func @transform_4(%arg0: i32) -> (i32, i32) {
    %c0_i32 = arith.constant 0 : i32
    %c0_i32_0 = arith.constant 0 : i32
    %c0_i32_1 = arith.constant 0 : i32
    return %c0_i32, %c0_i32_0 : i32, i32
  }
  func.func @transform_5(%arg0: i32) -> (i32, i32) {
    %c0_i32 = arith.constant 0 : i32
    %c0_i32_0 = arith.constant 0 : i32
    return %arg0, %c0_i32 : i32, i32
  }
  func.func @transform_6(%arg0: i32) -> (i32, i32) {
    %c0_i32 = arith.constant 0 : i32
    %c0_i32_0 = arith.constant 0 : i32
    return %arg0, %c0_i32 : i32, i32
  }
  func.func @transform_7(%arg0: i32) -> (i32, i32) {
    %c0_i32 = arith.constant 0 : i32
    %c0_i32_0 = arith.constant 0 : i32
    return %arg0, %c0_i32 : i32, i32
  }
  func.func @transform_8(%arg0: i32) -> (i32, i32) {
    %c0_i32 = arith.constant 0 : i32
    %c0_i32_0 = arith.constant 0 : i32
    return %arg0, %c0_i32 : i32, i32
  }
}

module attributes {stable_mosaic.version = 11 : i64} {
  func.func @gcn_layer_kernel(%arg0: i32, %arg1: i32, %arg2: memref<128x128xbf16, #tpu.memory_space<vmem>>, %arg3: memref<128x32xbf16, #tpu.memory_space<vmem>>, %arg4: memref<128x32xf32, #tpu.memory_space<vmem>>, %arg5: memref<128x32xbf16, #tpu.memory_space<vmem>>, %arg6: memref<128x32xf32, #tpu.memory_space<vmem>>, %arg7: memref<128x32xf32, #tpu.memory_space<vmem>>) attributes {dimension_semantics = [#tpu.dimension_semantics<parallel>, #tpu.dimension_semantics<arbitrary>], iteration_bounds = array<i64: 1, 1>, scalar_prefetch = 0 : i64, scratch_operands = 1 : i64, tpu.core_type = #tpu.core_type<tc>, window_params = [{transform_indices = @transform_0, window_bounds = array<i64: 128, 128>}, {transform_indices = @transform_1, window_bounds = array<i64: 128, 32>}, {transform_indices = @transform_2, window_bounds = array<i64: 128, 32>}, {transform_indices = @transform_3, window_bounds = array<i64: 128, 32>}, {transform_indices = @transform_4, window_bounds = array<i64: 128, 32>}]} {
    %c0_i32 = arith.constant 0 : i32
    %0 = arith.cmpi eq, %arg1, %c0_i32 : i32
    %1 = arith.extui %0 : i1 to i32
    %c0_i32_0 = arith.constant 0 : i32
    %2 = arith.cmpi ne, %1, %c0_i32_0 : i32
    scf.if %2 {
      %cst_10 = arith.constant 0.000000e+00 : f32
      %12 = vector.broadcast %cst_10 : f32 to vector<128x32xf32>
      %c0_11 = arith.constant 0 : index
      %c0_12 = arith.constant 0 : index
      %13 = vector.load %arg7[%c0_11, %c0_12] : memref<128x32xf32, #tpu.memory_space<vmem>>, vector<128x32xf32>
      tpu.vector_store %arg7[%c0_11, %c0_12], %12 {strides = array<i32>} : memref<128x32xf32, #tpu.memory_space<vmem>>, vector<128x32xf32>,
    } else {
    }
    %c0 = arith.constant 0 : index
    %c0_1 = arith.constant 0 : index
    %3 = vector.load %arg7[%c0, %c0_1] : memref<128x32xf32, #tpu.memory_space<vmem>>, vector<128x32xf32>
    %c0_2 = arith.constant 0 : index
    %c0_3 = arith.constant 0 : index
    %4 = vector.load %arg2[%c0_2, %c0_3] : memref<128x128xbf16, #tpu.memory_space<vmem>>, vector<128x128xbf16>
    %c0_4 = arith.constant 0 : index
    %c0_5 = arith.constant 0 : index
    %5 = vector.load %arg3[%c0_4, %c0_5] : memref<128x32xbf16, #tpu.memory_space<vmem>>, vector<128x32xbf16>
    %cst = arith.constant dense<0.000000e+00> : vector<128x32xf32>
    %6 = tpu.matmul %4, %5, %cst {dimension_numbers = #tpu.dot_dimension_numbers<[1], [0], [0], [1], [0, 0, 1, 1], [], []>} : vector<128x128xbf16>, vector<128x32xbf16>, vector<128x32xf32> -> vector<128x32xf32>
    %7 = arith.addf %3, %6 : vector<128x32xf32>
    %c0_6 = arith.constant 0 : index
    %c0_7 = arith.constant 0 : index
    %8 = vector.load %arg7[%c0_6, %c0_7] : memref<128x32xf32, #tpu.memory_space<vmem>>, vector<128x32xf32>
    tpu.vector_store %arg7[%c0_6, %c0_7], %7 {strides = array<i32>} : memref<128x32xf32, #tpu.memory_space<vmem>>, vector<128x32xf32>,
    %c0_i32_8 = arith.constant 0 : i32
    %9 = arith.cmpi eq, %arg1, %c0_i32_8 : i32
    %10 = arith.extui %9 : i1 to i32
    %c0_i32_9 = arith.constant 0 : i32
    %11 = arith.cmpi ne, %10, %c0_i32_9 : i32
    scf.if %11 {
      %c0_10 = arith.constant 0 : index
      %c0_11 = arith.constant 0 : index
      %12 = vector.load %arg7[%c0_10, %c0_11] : memref<128x32xf32, #tpu.memory_space<vmem>>, vector<128x32xf32>
      %13 = arith.truncf %12 : vector<128x32xf32> to vector<128x32xbf16>
      %c0_12 = arith.constant 0 : index
      %c0_13 = arith.constant 0 : index
      %14 = vector.load %arg5[%c0_12, %c0_13] : memref<128x32xbf16, #tpu.memory_space<vmem>>, vector<128x32xbf16>
      tpu.vector_store %arg5[%c0_12, %c0_13], %13 {strides = array<i32>} : memref<128x32xbf16, #tpu.memory_space<vmem>>, vector<128x32xbf16>,
      %c0_14 = arith.constant 0 : index
      %c0_15 = arith.constant 0 : index
      %15 = vector.load %arg4[%c0_14, %c0_15] : memref<128x32xf32, #tpu.memory_space<vmem>>, vector<128x32xf32>
      %16 = arith.addf %15, %12 : vector<128x32xf32>
      %c0_16 = arith.constant 0 : index
      %c0_17 = arith.constant 0 : index
      %17 = vector.load %arg6[%c0_16, %c0_17] : memref<128x32xf32, #tpu.memory_space<vmem>>, vector<128x32xf32>
      tpu.vector_store %arg6[%c0_16, %c0_17], %16 {strides = array<i32>} : memref<128x32xf32, #tpu.memory_space<vmem>>, vector<128x32xf32>,
    } else {
    }
    return
  }
  func.func @transform_0(%arg0: i32, %arg1: i32) -> (i32, i32) {
    %c0_i32 = arith.constant 0 : i32
    return %arg0, %arg1 : i32, i32
  }
  func.func @transform_1(%arg0: i32, %arg1: i32) -> (i32, i32) {
    %c0_i32 = arith.constant 0 : i32
    %c0_i32_0 = arith.constant 0 : i32
    return %arg1, %c0_i32 : i32, i32
  }
  func.func @transform_2(%arg0: i32, %arg1: i32) -> (i32, i32) {
    %c0_i32 = arith.constant 0 : i32
    %c0_i32_0 = arith.constant 0 : i32
    return %arg0, %c0_i32 : i32, i32
  }
  func.func @transform_3(%arg0: i32, %arg1: i32) -> (i32, i32) {
    %c0_i32 = arith.constant 0 : i32
    %c0_i32_0 = arith.constant 0 : i32
    return %arg0, %c0_i32 : i32, i32
  }
  func.func @transform_4(%arg0: i32, %arg1: i32) -> (i32, i32) {
    %c0_i32 = arith.constant 0 : i32
    %c0_i32_0 = arith.constant 0 : i32
    return %arg0, %c0_i32 : i32, i32
  }
}

</mosaic_0001>

<bundles_post_ra>
// kernel: vgae_encoder_forward.4
= control target key start
LH: loop header
LB: loop body
LE: loop exit
PB: predicated region body
PF: predicated region fallthrough
CT: control target
= control target key end

     0   :  { %vm22_vm0 = vcmask 261120   ;;  %v635_v2 = vmov 0.0   ;;  %s875_s0 = inlined_call_operand.vmem [shape: bf16[128,128], index: 0, kind: input, shape index: {}]   ;;  %s876_s1 = inlined_call_operand.vmem [shape: bf16[128,32], index: 1, kind: input, shape index: {}]   ;;  %s877_s2 = inlined_call_operand.vmem [shape: f32[128,32], index: 2, kind: input, shape index: {}]   ;;  %s878_s3 = inlined_call_operand.hbm [shape: bf16[128,32], index: 3, kind: output, shape index: {0}]   ;;  %s879_s4 = inlined_call_operand.vmem [shape: f32[128,32], index: 4, kind: output, shape index: {1}]  }
   0x1   :  { %v597_v0 = vld [vmem:[%s876_s1 + $0x38] sm:$0xff]   ;;  %v598_v1 = vld [vmem:[%s876_s1 + $0x30] sm:$0xff]   ;;  %25 = vst.msk [vmem:[#allocation2 + $0x10] sm:$0xff] %vm22_vm0, %v635_v2  ;;  %23 = vst.msk [vmem:[#allocation2] sm:$0xff] %vm22_vm0, %v635_v2 }
   0x2   :  { %545 = vmatprep.subr.bf16.mxu0 %v597_v0  ;;  %577 = vmatprep.subr.bf16.mxu1 %v597_v0  ;;  %24 = vst.msk [vmem:[#allocation2 + $0x8] sm:$0xff] %vm22_vm0, %v635_v2  ;;  %26 = vst.msk [vmem:[#allocation2 + $0x18] sm:$0xff] %vm22_vm0, %v635_v2  ;;  %v599_v3 = vld [vmem:[%s876_s1 + $0x28] sm:$0xff]   ;;  %v600_v4 = vld [vmem:[%s876_s1 + $0x20] sm:$0xff]  }
   0x3   :  { %27 = vst.msk [vmem:[#allocation2 + $0x20] sm:$0xff] %vm22_vm0, %v635_v2  ;;  %28 = vst.msk [vmem:[#allocation2 + $0x28] sm:$0xff] %vm22_vm0, %v635_v2  ;;  %546 = vmatpush3.bf16.msra.mxu0 %v597_v0  ;;  %585 = vmatpush3.bf16.msra.mxu1 %v597_v0  ;;  %v605_v5 = vld [vmem:[%s875_s0] sm:$0xff]   ;;  %v601_v7 = vld [vmem:[%s876_s1 + $0x18] sm:$0xff]  }
   0x4   :  { %29 = vst.msk [vmem:[#allocation2 + $0x30] sm:$0xff] %vm22_vm0, %v635_v2  ;;  %30 = vst.msk [vmem:[#allocation2 + $0x38] sm:$0xff] %vm22_vm0, %v635_v2  ;;  %547 = vmatprep.subr.bf16.mxu0 %v598_v1  ;;  %578 = vmatprep.subr.bf16.mxu1 %v598_v1  ;;  %v606_v6 = vld [vmem:[%s875_s0 + $0x20] sm:$0xff]   ;;  %v602_v8 = vld [vmem:[%s876_s1 + $0x10] sm:$0xff]  }
   0x5   :  { %31 = vst.msk [vmem:[#allocation2 + $0x40] sm:$0xff] %vm22_vm0, %v635_v2  ;;  %32 = vst.msk [vmem:[#allocation2 + $0x48] sm:$0xff] %vm22_vm0, %v635_v2  ;;  %561 = vmatprep.mubr.bf16.mxu0 %v605_v5  ;;  %569 = vmatprep.mubr.bf16.mxu1 %v606_v6 }
   0x6   :  { %33 = vst.msk [vmem:[#allocation2 + $0x50] sm:$0xff] %vm22_vm0, %v635_v2  ;;  %34 = vst.msk [vmem:[#allocation2 + $0x58] sm:$0xff] %vm22_vm0, %v635_v2 }
   0x7   :  { %35 = vst.msk [vmem:[#allocation2 + $0x60] sm:$0xff] %vm22_vm0, %v635_v2  ;;  %36 = vst.msk [vmem:[#allocation2 + $0x68] sm:$0xff] %vm22_vm0, %v635_v2  ;;  %548 = vmatpush3.bf16.msra.mxu0 %v598_v1  ;;  %586 = vmatpush3.bf16.msra.mxu1 %v598_v1 }
   0x8   :  { %37 = vst.msk [vmem:[#allocation2 + $0x70] sm:$0xff] %vm22_vm0, %v635_v2  ;;  %38 = vst.msk [vmem:[#allocation2 + $0x78] sm:$0xff] %vm22_vm0, %v635_v2  ;;  %549 = vmatprep.subr.bf16.mxu0 %v599_v3  ;;  %579 = vmatprep.subr.bf16.mxu1 %v599_v3 }
   0xb   :  { %550 = vmatpush3.bf16.msra.mxu0 %v599_v3  ;;  %587 = vmatpush3.bf16.msra.mxu1 %v599_v3 }
   0xc   :  { %551 = vmatprep.subr.bf16.mxu0 %v600_v4  ;;  %580 = vmatprep.subr.bf16.mxu1 %v600_v4 }
   0xf   :  { %552 = vmatpush3.bf16.msra.mxu0 %v600_v4  ;;  %588 = vmatpush3.bf16.msra.mxu1 %v600_v4 }
  0x10   :  { %553 = vmatprep.subr.bf16.mxu0 %v601_v7  ;;  %581 = vmatprep.subr.bf16.mxu1 %v601_v7 }
  0x11   :  { %10 = vsyncpa [#allocation4], 0  ;;  %v603_v9 = vld [vmem:[%s876_s1 + $0x8] sm:$0xff]   ;;  %v604_v10 = vld [vmem:[%s876_s1] sm:$0xff]   ;;  %vm396_vm1 = vcmask 257024   ;;  %s636_s15 = smov [#allocation3]  }
  0x12   :  { %v607_v11 = vld [vmem:[%s875_s0 + $0x8] sm:$0xff]   ;;  %v609_v13 = vld [vmem:[%s875_s0 + $0x10] sm:$0xff]   ;;  %v611_v15 = vld [vmem:[%s875_s0 + $0x18] sm:$0xff]   ;;  %s466_s1 = sshll.u32 %s636_s15, 4  ;;  %s467_s1 = int_to_ptr.vmem [resolvable:$true] %s466_s1 }
  0x13   :  { %554 = vmatpush3.bf16.msra.mxu0 %v601_v7  ;;  %589 = vmatpush3.bf16.msra.mxu1 %v601_v7  ;;  %v608_v12 = vld [vmem:[%s875_s0 + $0x28] sm:$0xff]   ;;  %v610_v14 = vld [vmem:[%s875_s0 + $0x30] sm:$0xff]   ;;  %v612_v16 = vld [vmem:[%s875_s0 + $0x38] sm:$0xff]   ;;  %s613_s28 = scalar_lea.vmem %s467_s1, 1024  ;;  %p618_p1 = scmp.lt.s32.totalorder %s467_s1, %s467_s1 }
  0x14   :  { %555 = vmatprep.subr.bf16.mxu0 %v602_v8  ;;  %582 = vmatprep.subr.bf16.mxu1 %v602_v8  ;;  %v41_v17 = vld [vmem:[#allocation2 + $0x10] sm:$0xff]  ;;  %v39_v21 = vld [vmem:[#allocation2] sm:$0xff]  ;;  %v42_v27 = vld [vmem:[#allocation2 + $0x18] sm:$0xff]  ;;  %p614_p0 = scmp.ne.s32.totalorder %s467_s1, %s613_s28  ;;  %p619_p2 = scmp.lt.s32.totalorder %s613_s28, %s613_s28 }
  0x15   :  { %v49_v18 = vld [vmem:[#allocation2 + $0x50] sm:$0xff]  ;;  %v47_v22 = vld [vmem:[#allocation2 + $0x40] sm:$0xff]  ;;  %v50_v28 = vld [vmem:[#allocation2 + $0x58] sm:$0xff] }
  0x16   :  { %v40_v33 = vld [vmem:[#allocation2 + $0x8] sm:$0xff]  ;;  %v45_v39 = vld [vmem:[#allocation2 + $0x30] sm:$0xff]  ;;  %v413_v47 = vld [vmem:[%s877_s2] sm:$0xff]  ;;  %p620_p3 = por %p619_p2, %p618_p1 }
  0x17   :  { %556 = vmatpush3.bf16.msra.mxu0 %v602_v8  ;;  %590 = vmatpush3.bf16.msra.mxu1 %v602_v8  ;;  %v48_v34 = vld [vmem:[#allocation2 + $0x48] sm:$0xff]  ;;  %v53_v40 = vld [vmem:[#allocation2 + $0x70] sm:$0xff]  ;;  %v43_v50 = vld [vmem:[#allocation2 + $0x20] sm:$0xff] }
  0x18   :  { %557 = vmatprep.subr.bf16.mxu0 %v603_v9  ;;  %583 = vmatprep.subr.bf16.mxu1 %v603_v9  ;;  %v415_v43 = vld [vmem:[%s877_s2 + $0x10] sm:$0xff]  ;;  %v51_v51 = vld [vmem:[#allocation2 + $0x60] sm:$0xff]  ;;  %v416_v61 = vld [vmem:[%s877_s2 + $0x18] sm:$0xff]  ;;  %p621_p4 = pnand %p620_p3, %p614_p0 }
  0x19   :  { %v423_v44 = vld [vmem:[%s877_s2 + $0x50] sm:$0xff]  ;;  %v421_v54 = vld [vmem:[%s877_s2 + $0x40] sm:$0xff]  ;;  %v46_v62 = vld [vmem:[#allocation2 + $0x38] sm:$0xff] }
  0x1a   :  { %v54_v63 = vld [vmem:[#allocation2 + $0x78] sm:$0xff] }
  0x1b   :  { %558 = vmatpush3.bf16.msra.mxu0 %v603_v9  ;;  %591 = vmatpush3.bf16.msra.mxu1 %v603_v9  ;;  %v424_v2 = vld [vmem:[%s877_s2 + $0x58] sm:$0xff] }
  0x1c   :  { %559 = vmatprep.subr.bf16.mxu0 %v604_v10  ;;  %584 = vmatprep.subr.bf16.mxu1 %v604_v10 }
  0x1f   :  { %560 = vmatpush3.bf16.msra.mxu0 %v604_v10  ;;  %592 = vmatpush3.bf16.msra.mxu1 %v604_v10 }
  0x22   :  { %562 = vmatmul.mubr.bf16.vlgmr.msra.gmra.mxu0 %v607_v11  ;;  %570 = vmatmul.mubr.bf16.vlgmr.msra.gmra.mxu1 %v608_v12  ;;  %v414_v11 = vld [vmem:[%s877_s2 + $0x8] sm:$0xff] }
  0x23   :  { %565 = vmatprep.mubr.bf16.mxu0 %v609_v13  ;;  %573 = vmatprep.mubr.bf16.mxu1 %v610_v14  ;;  %v44_v12 = vld [vmem:[#allocation2 + $0x28] sm:$0xff] }
  0x24   :  { %v52_v13 = vld [vmem:[#allocation2 + $0x68] sm:$0xff] }
  0x2a   :  { %566 = vmatmul.mubr.bf16.gmra.mxu0 %v611_v15  ;;  %574 = vmatmul.mubr.bf16.gmra.mxu1 %v612_v16  ;;  %v422_v16 = vld [vmem:[%s877_s2 + $0x48] sm:$0xff] }
  0xe2   :  { %v563_v19 = vpop.f32.mrf.mxu0  ;;  %v571_v20 = vpop.f32.mrf.mxu1 }
  0xe3   :  { %v282_v23 = vadd.f32 %v563_v19, %v41_v17  ;;  %v290_v24 = vadd.f32 %v571_v20, %v49_v18 }
  0xe4   :  { %v217_v25 = vpop.f32.mrf.mxu0  ;;  %v249_v26 = vpop.f32.mrf.mxu1 }
  0xe5   :  { %299 = vst.msk [vmem:[#allocation2 + $0x10] sm:$0xff] %vm22_vm0, %v282_v23  ;;  %307 = vst.msk [vmem:[#allocation2 + $0x50] sm:$0xff] %vm22_vm0, %v290_v24  ;;  %v280_v29 = vadd.f32 %v217_v25, %v39_v21  ;;  %v288_v30 = vadd.f32 %v249_v26, %v47_v22  ;;  %v419_v25 = vld [vmem:[%s877_s2 + $0x30] sm:$0xff] }
  0xe6   :  { %v564_v31 = vpop.f32.mrf.mxu0  ;;  %v572_v32 = vpop.f32.mrf.mxu1 }
  0xe7   :  { %297 = vst.msk [vmem:[#allocation2] sm:$0xff] %vm22_vm0, %v280_v29  ;;  %305 = vst.msk [vmem:[#allocation2 + $0x40] sm:$0xff] %vm22_vm0, %v288_v30  ;;  %v283_v35 = vadd.f32 %v564_v31, %v42_v27  ;;  %v291_v36 = vadd.f32 %v572_v32, %v50_v28  ;;  %v427_v28 = vld [vmem:[%s877_s2 + $0x70] sm:$0xff] }
  0xe8   :  { %v220_v37 = vpop.f32.mrf.mxu0  ;;  %v252_v38 = vpop.f32.mrf.mxu1 }
  0xe9   :  { %300 = vst.msk [vmem:[#allocation2 + $0x18] sm:$0xff] %vm22_vm0, %v283_v35  ;;  %308 = vst.msk [vmem:[#allocation2 + $0x58] sm:$0xff] %vm22_vm0, %v291_v36  ;;  %v281_v41 = vadd.f32 %v220_v37, %v40_v33  ;;  %v289_v42 = vadd.f32 %v252_v38, %v48_v34 }
  0xea   :  { %v567_v45 = vpop.f32.mrf.mxu0  ;;  %v575_v46 = vpop.f32.mrf.mxu1 }
  0xeb   :  { %298 = vst.msk [vmem:[#allocation2 + $0x8] sm:$0xff] %vm22_vm0, %v281_v41  ;;  %306 = vst.msk [vmem:[#allocation2 + $0x48] sm:$0xff] %vm22_vm0, %v289_v42  ;;  %v286_v48 = vadd.f32 %v567_v45, %v45_v39  ;;  %v294_v49 = vadd.f32 %v575_v46, %v53_v40  ;;  %v417_v41 = vld [vmem:[%s877_s2 + $0x20] sm:$0xff]  ;;  %v428_v46 = vld [vmem:[%s877_s2 + $0x78] sm:$0xff] }
  0xec   :  { %v318_v52 = vld [vmem:[#allocation2 + $0x10] sm:$0xff]  ;;  %v233_v55 = vpop.f32.mrf.mxu0  ;;  %v265_v56 = vpop.f32.mrf.mxu1  ;;  %v425_v42 = vld [vmem:[%s877_s2 + $0x60] sm:$0xff] }
  0xed   :  { %v326_v53 = vld [vmem:[#allocation2 + $0x50] sm:$0xff]  ;;  %v515_v57 = vpack.c.bf16 %v318_v52, %v318_v52  ;;  %v431_v58 = vadd.f32 %v415_v43, %v318_v52  ;;  %303 = vst.msk [vmem:[#allocation2 + $0x30] sm:$0xff] %vm22_vm0, %v286_v48  ;;  %311 = vst.msk [vmem:[#allocation2 + $0x70] sm:$0xff] %vm22_vm0, %v294_v49  ;;  %v284_v3 = vadd.f32 %v233_v55, %v43_v50  ;;  %v420_v43 = vld [vmem:[%s877_s2 + $0x38] sm:$0xff] }
  0xee   :  { %v523_v59 = vpack.c.bf16 %v326_v53, %v326_v53  ;;  %v439_v60 = vadd.f32 %v423_v44, %v326_v53  ;;  %v316_v0 = vld [vmem:[#allocation2] sm:$0xff]  ;;  %v292_v4 = vadd.f32 %v265_v56, %v51_v51  ;;  %v568_v5 = vpop.f32.mrf.mxu0  ;;  %v576_v6 = vpop.f32.mrf.mxu1  ;;  %v418_v51 = vld [vmem:[%s877_s2 + $0x28] sm:$0xff] }
  0xef   :  { %v324_v1 = vld [vmem:[#allocation2 + $0x40] sm:$0xff]  ;;  %399 = vst.msk [vmem:[#allocation3 + $0x8] sm:$0xf] %vm396_vm1, %v515_v57  ;;  %v513_v7 = vpack.c.bf16 %v316_v0, %v316_v0  ;;  %v429_v8 = vadd.f32 %v413_v47, %v316_v0  ;;  %v287_v17 = vadd.f32 %v568_v5, %v46_v62  ;;  %v295_v18 = vadd.f32 %v576_v6, %v54_v63 }
  0xf0   :  { %447 = vst.msk [vmem:[%s879_s4 + $0x10] sm:$0xff] %vm22_vm0, %v431_v58  ;;  %455 = vst.msk [vmem:[%s879_s4 + $0x50] sm:$0xff] %vm22_vm0, %v439_v60  ;;  %v521_v9 = vpack.c.bf16 %v324_v1, %v324_v1  ;;  %v437_v10 = vadd.f32 %v421_v54, %v324_v1  ;;  %v319_v14 = vld [vmem:[#allocation2 + $0x18] sm:$0xff]  ;;  %v236_v19 = vpop.f32.mrf.mxu0  ;;  %v268_v20 = vpop.f32.mrf.mxu1  ;;  %v426_v54 = vld [vmem:[%s877_s2 + $0x68] sm:$0xff] }
  0xf1   :  { %407 = vst.msk [vmem:[#allocation3 + $0x28] sm:$0xf] %vm396_vm1, %v523_v59  ;;  %v327_v15 = vld [vmem:[#allocation2 + $0x58] sm:$0xff]  ;;  %397 = vst.msk [vmem:[#allocation3] sm:$0xf] %vm396_vm1, %v513_v7  ;;  %v516_v21 = vpack.c.bf16 %v319_v14, %v319_v14  ;;  %v432_v22 = vadd.f32 %v416_v61, %v319_v14  ;;  %v285_v29 = vadd.f32 %v236_v19, %v44_v12 }
  0xf2   :  { %301 = vst.msk [vmem:[#allocation2 + $0x20] sm:$0xff] %vm22_vm0, %v284_v3  ;;  %309 = vst.msk [vmem:[#allocation2 + $0x60] sm:$0xff] %vm22_vm0, %v292_v4  ;;  %v524_v23 = vpack.c.bf16 %v327_v15, %v327_v15  ;;  %v440_v24 = vadd.f32 %v424_v2, %v327_v15  ;;  %v317_v26 = vld [vmem:[#allocation2 + $0x8] sm:$0xff]  ;;  %v293_v30 = vadd.f32 %v268_v20, %v52_v13 }
  0xf3   :  { %445 = vst.msk [vmem:[%s879_s4] sm:$0xff] %vm22_vm0, %v429_v8  ;;  %453 = vst.msk [vmem:[%s879_s4 + $0x40] sm:$0xff] %vm22_vm0, %v437_v10  ;;  %v325_v27 = vld [vmem:[#allocation2 + $0x48] sm:$0xff]  ;;  %v514_v31 = vpack.c.bf16 %v317_v26, %v317_v26  ;;  %v430_v32 = vadd.f32 %v414_v11, %v317_v26 }
  0xf4   :  { %405 = vst.msk [vmem:[#allocation3 + $0x20] sm:$0xf] %vm396_vm1, %v521_v9  ;;  %400 = vst.msk [vmem:[#allocation3 + $0xc] sm:$0xf] %vm396_vm1, %v516_v21  ;;  %v522_v33 = vpack.c.bf16 %v325_v27, %v325_v27  ;;  %v438_v34 = vadd.f32 %v422_v16, %v325_v27  ;;  %v322_v35 = vld [vmem:[#allocation2 + $0x30] sm:$0xff] }
  0xf5   :  { %304 = vst.msk [vmem:[#allocation2 + $0x38] sm:$0xff] %vm22_vm0, %v287_v17  ;;  %312 = vst.msk [vmem:[#allocation2 + $0x78] sm:$0xff] %vm22_vm0, %v295_v18  ;;  %v330_v36 = vld [vmem:[#allocation2 + $0x70] sm:$0xff]  ;;  %v519_v37 = vpack.c.bf16 %v322_v35, %v322_v35  ;;  %v435_v38 = vadd.f32 %v419_v25, %v322_v35 }
  0xf6   :  { %448 = vst.msk [vmem:[%s879_s4 + $0x18] sm:$0xff] %vm22_vm0, %v432_v22  ;;  %456 = vst.msk [vmem:[%s879_s4 + $0x58] sm:$0xff] %vm22_vm0, %v440_v24  ;;  %v527_v39 = vpack.c.bf16 %v330_v36, %v330_v36  ;;  %v443_v40 = vadd.f32 %v427_v28, %v330_v36 }
  0xf7   :  { %408 = vst.msk [vmem:[#allocation3 + $0x2c] sm:$0xf] %vm396_vm1, %v524_v23  ;;  %398 = vst.msk [vmem:[#allocation3 + $0x4] sm:$0xf] %vm396_vm1, %v514_v31 }
  0xf8   :  { %302 = vst.msk [vmem:[#allocation2 + $0x28] sm:$0xff] %vm22_vm0, %v285_v29  ;;  %310 = vst.msk [vmem:[#allocation2 + $0x68] sm:$0xff] %vm22_vm0, %v293_v30 }
  0xf9   :  { %446 = vst.msk [vmem:[%s879_s4 + $0x8] sm:$0xff] %vm22_vm0, %v430_v32  ;;  %454 = vst.msk [vmem:[%s879_s4 + $0x48] sm:$0xff] %vm22_vm0, %v438_v34  ;;  %v320_v44 = vld [vmem:[#allocation2 + $0x20] sm:$0xff] }
  0xfa   :  { %406 = vst.msk [vmem:[#allocation3 + $0x24] sm:$0xf] %vm396_vm1, %v522_v33  ;;  %403 = vst.msk [vmem:[#allocation3 + $0x18] sm:$0xf] %vm396_vm1, %v519_v37  ;;  %v328_v45 = vld [vmem:[#allocation2 + $0x60] sm:$0xff]  ;;  %v517_v47 = vpack.c.bf16 %v320_v44, %v320_v44  ;;  %v433_v48 = vadd.f32 %v417_v41, %v320_v44 }
  0xfb   :  { %451 = vst.msk [vmem:[%s879_s4 + $0x30] sm:$0xff] %vm22_vm0, %v435_v38  ;;  %459 = vst.msk [vmem:[%s879_s4 + $0x70] sm:$0xff] %vm22_vm0, %v443_v40  ;;  %v525_v49 = vpack.c.bf16 %v328_v45, %v328_v45  ;;  %v441_v50 = vadd.f32 %v425_v42, %v328_v45 }
  0xfc   :  { %411 = vst.msk [vmem:[#allocation3 + $0x38] sm:$0xf] %vm396_vm1, %v527_v39  ;;  %v323_v52 = vld [vmem:[#allocation2 + $0x38] sm:$0xff]  ;;  %401 = vst.msk [vmem:[#allocation3 + $0x10] sm:$0xf] %vm396_vm1, %v517_v47 }
  0xfd   :  { %v331_v53 = vld [vmem:[#allocation2 + $0x78] sm:$0xff]  ;;  %449 = vst.msk [vmem:[%s879_s4 + $0x20] sm:$0xff] %vm22_vm0, %v433_v48  ;;  %457 = vst.msk [vmem:[%s879_s4 + $0x60] sm:$0xff] %vm22_vm0, %v441_v50  ;;  %v520_v55 = vpack.c.bf16 %v323_v52, %v323_v52  ;;  %v436_v56 = vadd.f32 %v420_v43, %v323_v52 }
  0xfe   :  { %409 = vst.msk [vmem:[#allocation3 + $0x30] sm:$0xf] %vm396_vm1, %v525_v49  ;;  %v528_v57 = vpack.c.bf16 %v331_v53, %v331_v53  ;;  %v444_v58 = vadd.f32 %v428_v46, %v331_v53 }
  0xff   :  { %v321_v59 = vld [vmem:[#allocation2 + $0x28] sm:$0xff]  ;;  %404 = vst.msk [vmem:[#allocation3 + $0x1c] sm:$0xf] %vm396_vm1, %v520_v55 }
 0x100   :  { %v329_v60 = vld [vmem:[#allocation2 + $0x68] sm:$0xff]  ;;  %452 = vst.msk [vmem:[%s879_s4 + $0x38] sm:$0xff] %vm22_vm0, %v436_v56  ;;  %460 = vst.msk [vmem:[%s879_s4 + $0x78] sm:$0xff] %vm22_vm0, %v444_v58  ;;  %v518_v61 = vpack.c.bf16 %v321_v59, %v321_v59  ;;  %v434_v62 = vadd.f32 %v418_v51, %v321_v59 }
 0x101   :  { %412 = vst.msk [vmem:[#allocation3 + $0x3c] sm:$0xf] %vm396_vm1, %v528_v57  ;;  %v526_v63 = vpack.c.bf16 %v329_v60, %v329_v60  ;;  %v442_v0 = vadd.f32 %v426_v54, %v329_v60 }
 0x102   :  { %402 = vst.msk [vmem:[#allocation3 + $0x14] sm:$0xf] %vm396_vm1, %v518_v61 }
 0x103   :  { %450 = vst.msk [vmem:[%s879_s4 + $0x28] sm:$0xff] %vm22_vm0, %v434_v62  ;;  %458 = vst.msk [vmem:[%s879_s4 + $0x68] sm:$0xff] %vm22_vm0, %v442_v0 }
 0x104   :  { %410 = vst.msk [vmem:[#allocation3 + $0x34] sm:$0xf] %vm396_vm1, %v526_v63 }
 0x105   :  { %624 = shalt.err (!%p621_p4)
}
 0x106   :  { %s637_s29 = smov 64   ;;  %s638_s30 = smov 4  }
 0x107   :  { %472 = dma.vmem_to_hbm [thread:$0]  %s467_s1, 1024, %s878_s3, [#allocation4], %s637_s29, %s637_s29, %s638_s30  }
 0x108   :  { %633 = dma.done.wait [#allocation4], 1024  }
 0x109   :  { %634 = vsyncadd [#allocation4], 4294966272 }
 0x10a   :  { %480 = vsyncpa [#allocation4], 1 }

// kernel: vgae_encoder_forward.5
= control target key start
LH: loop header
LB: loop body
LE: loop exit
PB: predicated region body
PF: predicated region fallthrough
CT: control target
= control target key end

     0   :  { %vm53_vm0 = vcmask 261120   ;;  %vm278_vm1 = vcmask 523264   ;;  %s1929_s1 = inlined_call_operand.vmem [shape: f32[32,64], index: 1, kind: input, shape index: {}]   ;;  %s1930_s0 = inlined_call_operand.vmem [shape: f32[128,32], index: 0, kind: input, shape index: {}]   ;;  %s1931_s3 = inlined_call_operand.vmem [shape: f32[64,64], index: 3, kind: input, shape index: {}]   ;;  %s1932_s2 = inlined_call_operand.vmem [shape: f32[1,64], index: 2, kind: input, shape index: {}]   ;;  %s1933_s4 = inlined_call_operand.vmem [shape: f32[1,64], index: 4, kind: input, shape index: {}]   ;;  %s1934_s7 = inlined_call_operand.vmem [shape: f32[128,32], index: 7, kind: output, shape index: {1}]   ;;  %s1935_s5 = inlined_call_operand.vmem [shape: f32[128,32], index: 5, kind: input, shape index: {}]   ;;  %s1936_s8 = inlined_call_operand.vmem [shape: f32[128,32], index: 8, kind: output, shape index: {2}]   ;;  %s1937_s6 = inlined_call_operand.vmem [shape: f32[128,32], index: 6, kind: output, shape index: {0}]  }
   0x1   :  { %v45_v0 = vld [vmem:[%s1929_s1 + $0x18] sm:$0xff]  ;;  %v44_v1 = vld [vmem:[%s1929_s1 + $0x10] sm:$0xff]  ;;  %v26_v2 = vld [vmem:[%s1930_s0] sm:$0xff] }
   0x2   :  { %1010 = vmatprep.subr.mxu0 %v45_v0  ;;  %v43_v3 = vld [vmem:[%s1929_s1 + $0x8] sm:$0xff]  ;;  %1018 = vmatprep.mubr.msk.f32.mxu0 %vm53_vm0, %v26_v2  ;;  %v42_v4 = vld [vmem:[%s1929_s1] sm:$0xff]  ;;  %v270_v6 = vld [vmem:[%s1931_s3 + $0x38] sm:$0xff] }
   0x3   :  { %1011 = vmatpush3.msra.mxu0 %v45_v0  ;;  %v27_v5 = vld [vmem:[%s1930_s0 + $0x8] sm:$0xff]  ;;  %v28_v7 = vld [vmem:[%s1930_s0 + $0x10] sm:$0xff]  ;;  %1082 = vmatprep.subr.mxu1 %v270_v6  ;;  %v29_v9 = vld [vmem:[%s1930_s0 + $0x18] sm:$0xff] }
   0x4   :  { %1012 = vmatprep.subr.mxu0 %v44_v1  ;;  %v269_v8 = vld [vmem:[%s1931_s3 + $0x30] sm:$0xff]  ;;  %1090 = vmatpush3.msra.mxu1 %v270_v6  ;;  %v268_v10 = vld [vmem:[%s1931_s3 + $0x28] sm:$0xff]  ;;  %v30_v11 = vld [vmem:[%s1930_s0 + $0x20] sm:$0xff] }
   0x5   :  { %1013 = vmatpush3.msra.mxu0 %v44_v1  ;;  %1083 = vmatprep.subr.mxu1 %v269_v8  ;;  %v267_v12 = vld [vmem:[%s1931_s3 + $0x20] sm:$0xff]  ;;  %v31_v13 = vld [vmem:[%s1930_s0 + $0x28] sm:$0xff]  ;;  %v266_v14 = vld [vmem:[%s1931_s3 + $0x18] sm:$0xff] }
   0x6   :  { %1014 = vmatprep.subr.mxu0 %v43_v3  ;;  %1091 = vmatpush3.msra.mxu1 %v269_v8  ;;  %v32_v15 = vld [vmem:[%s1930_s0 + $0x30] sm:$0xff]  ;;  %v33_v17 = vld [vmem:[%s1930_s0 + $0x38] sm:$0xff]  ;;  %v34_v18 = vld [vmem:[%s1930_s0 + $0x40] sm:$0xff] }
   0x7   :  { %1015 = vmatpush3.msra.mxu0 %v43_v3  ;;  %1084 = vmatprep.subr.mxu1 %v268_v10  ;;  %v265_v16 = vld [vmem:[%s1931_s3 + $0x10] sm:$0xff]  ;;  %v35_v19 = vld [vmem:[%s1930_s0 + $0x48] sm:$0xff]  ;;  %v37_v21 = vld [vmem:[%s1930_s0 + $0x58] sm:$0xff] }
   0x8   :  { %1016 = vmatprep.subr.mxu0 %v42_v4  ;;  %1092 = vmatpush3.msra.mxu1 %v268_v10  ;;  %v36_v20 = vld [vmem:[%s1930_s0 + $0x50] sm:$0xff]  ;;  %v38_v22 = vld [vmem:[%s1930_s0 + $0x60] sm:$0xff]  ;;  %v39_v23 = vld [vmem:[%s1930_s0 + $0x68] sm:$0xff] }
   0x9   :  { %1017 = vmatpush3.msra.mxu0 %v42_v4  ;;  %1085 = vmatprep.subr.mxu1 %v267_v12  ;;  %v40_v24 = vld [vmem:[%s1930_s0 + $0x70] sm:$0xff]  ;;  %v41_v25 = vld [vmem:[%s1930_s0 + $0x78] sm:$0xff]  ;;  %v264_v26 = vld [vmem:[%s1931_s3 + $0x8] sm:$0xff] }
   0xa   :  { %1019 = vmatmul.mubr.msk.f32.vlgmr.msra.gmra.mxu0 %vm53_vm0, %v27_v5  ;;  %1042 = vmatprep.subr.mxu0 %v270_v6  ;;  %v263_v27 = vld [vmem:[%s1931_s3] sm:$0xff] }
   0xb   :  { %1021 = vmatprep.mubr.msk.f32.mxu0 %vm53_vm0, %v28_v7  ;;  %1043 = vmatpush3.msra.mxu0 %v270_v6  ;;  %v932_v28 = vld [vmem:[%s1932_s2] ss:$0 sm:$0xff] }
   0xc   :  { %1044 = vmatprep.subr.mxu0 %v269_v8  ;;  %1093 = vmatpush3.msra.mxu1 %v267_v12 }
   0xd   :  { %1045 = vmatpush3.msra.mxu0 %v269_v8  ;;  %1086 = vmatprep.subr.mxu1 %v266_v14 }
   0xe   :  { %1022 = vmatmul.mubr.msk.f32.gmra.mxu0 %vm53_vm0, %v29_v9  ;;  %1046 = vmatprep.subr.mxu0 %v268_v10 }
   0xf   :  { %1024 = vmatprep.mubr.msk.f32.mxu0 %vm53_vm0, %v30_v11  ;;  %1047 = vmatpush3.msra.mxu0 %v268_v10 }
  0x10   :  { %1048 = vmatprep.subr.mxu0 %v267_v12  ;;  %1094 = vmatpush3.msra.mxu1 %v266_v14 }
  0x11   :  { %1049 = vmatpush3.msra.mxu0 %v267_v12  ;;  %1087 = vmatprep.subr.mxu1 %v265_v16 }
  0x12   :  { %1025 = vmatmul.mubr.msk.f32.gmra.mxu0 %vm53_vm0, %v31_v13  ;;  %1050 = vmatprep.subr.mxu0 %v266_v14  ;;  %v1331_v13 = vld [vmem:[%s1933_s4] ss:$0 sm:$0xff] }
  0x13   :  { %1027 = vmatprep.mubr.msk.f32.mxu0 %vm53_vm0, %v32_v15  ;;  %1051 = vmatpush3.msra.mxu0 %v266_v14 }
  0x14   :  { %1052 = vmatprep.subr.mxu0 %v265_v16  ;;  %1095 = vmatpush3.msra.mxu1 %v265_v16 }
  0x15   :  { %1053 = vmatpush3.msra.mxu0 %v265_v16  ;;  %1088 = vmatprep.subr.mxu1 %v264_v26 }
  0x16   :  { %1028 = vmatmul.mubr.msk.f32.gmra.mxu0 %vm53_vm0, %v33_v17  ;;  %1054 = vmatprep.subr.mxu0 %v264_v26 }
  0x17   :  { %1030 = vmatprep.mubr.msk.f32.mxu0 %vm53_vm0, %v34_v18  ;;  %1055 = vmatpush3.msra.mxu0 %v264_v26 }
  0x18   :  { %1096 = vmatpush3.msra.mxu1 %v264_v26  ;;  %1056 = vmatprep.subr.mxu0 %v263_v27 }
  0x19   :  { %1089 = vmatprep.subr.mxu1 %v263_v27  ;;  %1057 = vmatpush3.msra.mxu0 %v263_v27 }
  0x1a   :  { %1031 = vmatmul.mubr.msk.f32.gmra.mxu0 %vm53_vm0, %v35_v19  ;;  %1097 = vmatpush3.msra.mxu1 %v263_v27 }
  0x1b   :  { %1033 = vmatprep.mubr.msk.f32.mxu0 %vm53_vm0, %v36_v20 }
  0x1e   :  { %1034 = vmatmul.mubr.msk.f32.gmra.mxu0 %vm53_vm0, %v37_v21 }
  0x1f   :  { %1036 = vmatprep.mubr.msk.f32.mxu0 %vm53_vm0, %v38_v22 }
  0x22   :  { %1037 = vmatmul.mubr.msk.f32.gmra.mxu0 %vm53_vm0, %v39_v23 }
  0x23   :  { %1039 = vmatprep.mubr.msk.f32.mxu0 %vm53_vm0, %v40_v24 }
  0x26   :  { %1040 = vmatmul.mubr.msk.f32.gmra.mxu0 %vm53_vm0, %v41_v25 }
  0xca   :  { %v1020_v29 = vpop.f32.mrf.mxu0 }
  0xcb   :  { %v174_v30 = vadd.f32 %v1020_v29, %v932_v28 }
  0xcc   :  { %v168_v31 = vpop.f32.mrf.mxu0 }
  0xcd   :  { %v169_v32 = vadd.f32 %v932_v28, %v168_v31  ;;  %v248_v35 = vmax.f32 %v174_v30, 0.0 }
  0xce   :  { %v1023_v33 = vpop.f32.mrf.mxu0 }
  0xcf   :  { %v247_v34 = vmax.f32 %v169_v32, 0.0  ;;  %v184_v36 = vadd.f32 %v1023_v33, %v932_v28 }
  0xd0   :  { %v178_v37 = vpop.f32.mrf.mxu0 }
  0xd1   :  { %v179_v38 = vadd.f32 %v932_v28, %v178_v37  ;;  %1058 = vmatprep.mubr.msk.f32.mxu0 %vm278_vm1, %v247_v34  ;;  %v250_v42 = vmax.f32 %v184_v36, 0.0 }
  0xd2   :  { %v1026_v39 = vpop.f32.mrf.mxu0  ;;  %1059 = vmatmul.mubr.msk.f32.vlgmr.msra.gmra.mxu0 %vm278_vm1, %v248_v35 }
  0xd3   :  { %v249_v40 = vmax.f32 %v179_v38, 0.0  ;;  %v194_v41 = vadd.f32 %v1026_v39, %v932_v28 }
  0xd4   :  { %v188_v43 = vpop.f32.mrf.mxu0 }
  0xd5   :  { %v189_v44 = vadd.f32 %v932_v28, %v188_v43  ;;  %1061 = vmatprep.mubr.msk.f32.mxu1 %vm278_vm1, %v249_v40  ;;  %v252_v45 = vmax.f32 %v194_v41, 0.0 }
  0xd6   :  { %v1029_v46 = vpop.f32.mrf.mxu0  ;;  %1062 = vmatmul.mubr.msk.f32.vlgmr.msra.gmra.mxu1 %vm278_vm1, %v250_v42 }
  0xd7   :  { %v251_v47 = vmax.f32 %v189_v44, 0.0  ;;  %v204_v48 = vadd.f32 %v1029_v46, %v932_v28 }
  0xd8   :  { %v198_v49 = vpop.f32.mrf.mxu0 }
  0xd9   :  { %v199_v50 = vadd.f32 %v932_v28, %v198_v49  ;;  %1064 = vmatprep.mubr.msk.f32.mxu1 %vm278_vm1, %v251_v47  ;;  %v254_v51 = vmax.f32 %v204_v48, 0.0 }
  0xda   :  { %v1032_v52 = vpop.f32.mrf.mxu0  ;;  %1065 = vmatmul.mubr.msk.f32.gmra.mxu1 %vm278_vm1, %v252_v45 }
  0xdb   :  { %v253_v53 = vmax.f32 %v199_v50, 0.0  ;;  %v214_v54 = vadd.f32 %v1032_v52, %v932_v28 }
  0xdc   :  { %v208_v55 = vpop.f32.mrf.mxu0 }
  0xdd   :  { %v209_v56 = vadd.f32 %v932_v28, %v208_v55  ;;  %1067 = vmatprep.mubr.msk.f32.mxu1 %vm278_vm1, %v253_v53  ;;  %v256_v57 = vmax.f32 %v214_v54, 0.0 }
  0xde   :  { %v1035_v58 = vpop.f32.mrf.mxu0  ;;  %1068 = vmatmul.mubr.msk.f32.gmra.mxu1 %vm278_vm1, %v254_v51 }
  0xdf   :  { %v255_v59 = vmax.f32 %v209_v56, 0.0  ;;  %v224_v60 = vadd.f32 %v1035_v58, %v932_v28 }
  0xe0   :  { %v218_v61 = vpop.f32.mrf.mxu0 }
  0xe1   :  { %v219_v62 = vadd.f32 %v932_v28, %v218_v61  ;;  %1070 = vmatprep.mubr.msk.f32.mxu1 %vm278_vm1, %v255_v59  ;;  %v258_v63 = vmax.f32 %v224_v60, 0.0 }
  0xe2   :  { %v1038_v0 = vpop.f32.mrf.mxu0  ;;  %1071 = vmatmul.mubr.msk.f32.gmra.mxu1 %vm278_vm1, %v256_v57 }
  0xe3   :  { %v257_v1 = vmax.f32 %v219_v62, 0.0  ;;  %v234_v2 = vadd.f32 %v1038_v0, %v932_v28 }
  0xe4   :  { %v228_v3 = vpop.f32.mrf.mxu0 }
  0xe5   :  { %v229_v4 = vadd.f32 %v932_v28, %v228_v3  ;;  %1073 = vmatprep.mubr.msk.f32.mxu1 %vm278_vm1, %v257_v1  ;;  %v260_v5 = vmax.f32 %v234_v2, 0.0 }
  0xe6   :  { %v1041_v6 = vpop.f32.mrf.mxu0  ;;  %1074 = vmatmul.mubr.msk.f32.gmra.mxu1 %vm278_vm1, %v258_v63 }
  0xe7   :  { %v259_v7 = vmax.f32 %v229_v4, 0.0  ;;  %v244_v8 = vadd.f32 %v1041_v6, %v932_v28 }
  0xe8   :  { %v238_v9 = vpop.f32.mrf.mxu0 }
  0xe9   :  { %v239_v10 = vadd.f32 %v932_v28, %v238_v9  ;;  %1076 = vmatprep.mubr.msk.f32.mxu1 %vm278_vm1, %v259_v7  ;;  %v262_v11 = vmax.f32 %v244_v8, 0.0 }
  0xea   :  { %1077 = vmatmul.mubr.msk.f32.gmra.mxu1 %vm278_vm1, %v260_v5 }
  0xeb   :  { %v261_v12 = vmax.f32 %v239_v10, 0.0 }
  0xed   :  { %1079 = vmatprep.mubr.msk.f32.mxu1 %vm278_vm1, %v261_v12 }
  0xee   :  { %1080 = vmatmul.mubr.msk.f32.gmra.mxu1 %vm278_vm1, %v262_v11 }
 0x192   :  { %v1060_v14 = vpop.f32.mrf.mxu0 }
 0x193   :  { %v1334_v15 = vadd.f32 %v1060_v14, %v1331_v13 }
 0x194   :  { %v393_v16 = vpop.f32.mrf.mxu0 }
 0x195   :  { %v521_v17 = vand.u32 2147483647, %v1334_v15  ;;  %889 = vst.msk [vmem:[%s1934_s7 + $0x8] sm:$0xff] %vm53_vm0, %v1334_v15  ;;  %v1343_v18 = vadd.f32 %v1331_v13, %v393_v16  ;;  %vm489_vm2 = vcmp.ne.f32.partialorder %v1334_v15, %v1334_v15 }
 0x196   :  { %v1063_v19 = vpop.f32.mrf.mxu1 }
 0x197   :  { %v537_v20 = vsub.f32 0.0, %v521_v17  ;;  %v520_v21 = vand.u32 2147483647, %v1343_v18  ;;  %888 = vst.msk [vmem:[%s1934_s7] sm:$0xff] %vm53_vm0, %v1343_v18  ;;  %v1352_v22 = vadd.f32 %v1063_v19, %v1331_v13  ;;  %vm488_vm6 = vcmp.ne.f32.partialorder %v1343_v18, %v1343_v18 }
 0x198   :  { %v403_v23 = vpop.f32.mrf.mxu1 }
 0x199   :  { %v554_v24 = vmul.f32 1.442695, %v537_v20  ;;  %v523_v25 = vand.u32 2147483647, %v1352_v22  ;;  %891 = vst.msk [vmem:[%s1934_s7 + $0x18] sm:$0xff] %vm53_vm0, %v1352_v22  ;;  %v1361_v26 = vadd.f32 %v1331_v13, %v403_v23  ;;  %v536_v27 = vsub.f32 0.0, %v520_v21 }
 0x19a   :  { %v1066_v28 = vpop.f32.mrf.mxu1  ;;  %v473_v21 = vmax.f32 %v1334_v15, 0.0  ;;  %v472_v23 = vmax.f32 %v1343_v18, 0.0  ;;  %vm491_vm4 = vcmp.ne.f32.partialorder %v1352_v22, %v1352_v22 }
 0x19b   :  { %1099 = vpow2.f32 %v554_v24  ;;  %v539_v29 = vsub.f32 0.0, %v523_v25  ;;  %v522_v30 = vand.u32 2147483647, %v1361_v26  ;;  %890 = vst.msk [vmem:[%s1934_s7 + $0x10] sm:$0xff] %vm53_vm0, %v1361_v26  ;;  %v1370_v31 = vadd.f32 %v1066_v28, %v1331_v13 }
 0x19c   :  { %v413_v32 = vpop.f32.mrf.mxu1  ;;  %v552_v36 = vmul.f32 1.442695, %v536_v27  ;;  %vm490_vm8 = vcmp.ne.f32.partialorder %v1361_v26, %v1361_v26 }
 0x19d   :  { %v558_v33 = vmul.f32 1.442695, %v539_v29  ;;  %v538_v34 = vsub.f32 0.0, %v522_v30  ;;  %v1373_v35 = vadd.f32 %v1331_v13, %v413_v32  ;;  %v525_v37 = vand.u32 2147483647, %v1370_v31  ;;  %893 = vst.msk [vmem:[%s1934_s7 + $0x28] sm:$0xff] %vm53_vm0, %v1370_v31 }
 0x19e   :  { %v1069_v38 = vpop.f32.mrf.mxu1  ;;  %vm493_vm12 = vcmp.ne.f32.partialorder %v1370_v31, %v1370_v31 }
 0x19f   :  { %1101 = vpow2.f32 %v558_v33  ;;  %v524_v39 = vand.u32 2147483647, %v1373_v35  ;;  %892 = vst.msk [vmem:[%s1934_s7 + $0x20] sm:$0xff] %vm53_vm0, %v1373_v35  ;;  %v1388_v40 = vadd.f32 %v1069_v38, %v1331_v13  ;;  %v556_v41 = vmul.f32 1.442695, %v538_v34 }
 0x1a0   :  { %v423_v42 = vpop.f32.mrf.mxu1  ;;  %v541_v43 = vsub.f32 0.0, %v525_v37  ;;  %1103 = vpow2.f32 %v552_v36  ;;  %v475_v36 = vmax.f32 %v1352_v22, 0.0  ;;  %v474_v38 = vmax.f32 %v1361_v26, 0.0 }
 0x1a1   :  { %v540_v44 = vsub.f32 0.0, %v524_v39  ;;  %895 = vst.msk [vmem:[%s1934_s7 + $0x38] sm:$0xff] %vm53_vm0, %v1388_v40  ;;  %v1396_v45 = vadd.f32 %v1331_v13, %v423_v42  ;;  %v527_v46 = vand.u32 2147483647, %v1388_v40  ;;  %1105 = vpow2.f32 %v556_v41 }
 0x1a2   :  { %v1072_v47 = vpop.f32.mrf.mxu1  ;;  %v562_v52 = vmul.f32 1.442695, %v541_v43  ;;  %v477_v42 = vmax.f32 %v1370_v31, 0.0  ;;  %vm492_vm10 = vcmp.ne.f32.partialorder %v1373_v35, %v1373_v35  ;;  %vm495_vm15 = vcmp.ne.f32.partialorder %v1388_v40, %v1388_v40 }
 0x1a3   :  { %v560_v48 = vmul.f32 1.442695, %v540_v44  ;;  %v526_v49 = vand.u32 2147483647, %v1396_v45  ;;  %894 = vst.msk [vmem:[%s1934_s7 + $0x30] sm:$0xff] %vm53_vm0, %v1396_v45  ;;  %v1406_v50 = vadd.f32 %v1072_v47, %v1331_v13  ;;  %v543_v54 = vsub.f32 0.0, %v527_v46 }
 0x1a4   :  { %v433_v51 = vpop.f32.mrf.mxu1  ;;  %vm494_vm13 = vcmp.ne.f32.partialorder %v1396_v45, %v1396_v45 }
 0x1a5   :  { %v542_v53 = vsub.f32 0.0, %v526_v49  ;;  %897 = vst.msk [vmem:[%s1934_s7 + $0x48] sm:$0xff] %vm53_vm0, %v1406_v50  ;;  %v529_v55 = vand.u32 2147483647, %v1406_v50  ;;  %v1415_v56 = vadd.f32 %v1331_v13, %v433_v51  ;;  %1107 = vpow2.f32 %v560_v48 }
 0x1a6   :  { %v1075_v57 = vpop.f32.mrf.mxu1  ;;  %1109 = vpow2.f32 %v562_v52  ;;  %v566_v0 = vmul.f32 1.442695, %v543_v54  ;;  %v476_v51 = vmax.f32 %v1373_v35, 0.0  ;;  %v478_v54 = vmax.f32 %v1396_v45, 0.0 }
 0x1a7   :  { %v564_v58 = vmul.f32 1.442695, %v542_v53  ;;  %v1418_v59 = vadd.f32 %v1075_v57, %v1331_v13  ;;  %v528_v61 = vand.u32 2147483647, %v1415_v56  ;;  %896 = vst.msk [vmem:[%s1934_s7 + $0x40] sm:$0xff] %vm53_vm0, %v1415_v56  ;;  %v545_v1 = vsub.f32 0.0, %v529_v55 }
 0x1a8   :  { %v1420_v60 = vpop.eup %1099  ;;  %v443_v62 = vpop.f32.mrf.mxu1  ;;  %v479_v55 = vmax.f32 %v1388_v40, 0.0 }
 0x1a9   :  { %899 = vst.msk [vmem:[%s1934_s7 + $0x58] sm:$0xff] %vm53_vm0, %v1418_v59  ;;  %v1434_v63 = vadd.f32 %v1331_v13, %v443_v62  ;;  %v544_v2 = vsub.f32 0.0, %v528_v61  ;;  %v593_v4 = vadd.f32 1.0, %v1420_v60  ;;  %1111 = vpow2.f32 %v564_v58 }
 0x1aa   :  { %v1078_v3 = vpop.f32.mrf.mxu1  ;;  %v531_v9 = vand.u32 2147483647, %v1418_v59  ;;  %v570_v16 = vmul.f32 1.442695, %v545_v1  ;;  %v596_v34 = vmul.f32 -0.5, %v1420_v60  ;;  %v480_v62 = vmax.f32 %v1415_v56, 0.0 }
 0x1ab   :  { %v530_v5 = vand.u32 2147483647, %v1434_v63  ;;  %898 = vst.msk [vmem:[%s1934_s7 + $0x50] sm:$0xff] %vm53_vm0, %v1434_v63  ;;  %v1444_v6 = vadd.f32 %v1078_v3, %v1331_v13  ;;  %v568_v8 = vmul.f32 1.442695, %v544_v2  ;;  %1113 = vlog2.f32 %v593_v4 }
 0x1ac   :  { %v1446_v7 = vpop.eup %1101  ;;  %v453_v10 = vpop.f32.mrf.mxu1  ;;  %1115 = vpow2.f32 %v566_v0  ;;  %v547_v24 = vsub.f32 0.0, %v531_v9  ;;  %v597_v49 = vadd.f32 1.0, %v596_v34 }
 0x1ad   :  { %v546_v11 = vsub.f32 0.0, %v530_v5  ;;  %v533_v12 = vand.u32 2147483647, %v1444_v6  ;;  %901 = vst.msk [vmem:[%s1934_s7 + $0x68] sm:$0xff] %vm53_vm0, %v1444_v6  ;;  %v1456_v14 = vadd.f32 %v1331_v13, %v453_v10  ;;  %v611_v19 = vadd.f32 1.0, %v1446_v7  ;;  %v1459_v20 = vpop.eup %1103 }
 0x1ae   :  { %v1081_v17 = vpop.f32.mrf.mxu1  ;;  %1117 = vpow2.f32 %v568_v8  ;;  %v1472_v29 = vpop.eup %1105  ;;  %v584_v37 = vadd.f32 1.0, %v1459_v20  ;;  %v614_v41 = vmul.f32 -0.5, %v1446_v7  ;;  %v574_v44 = vmul.f32 1.442695, %v547_v24 }
 0x1af   :  { %900 = vst.msk [vmem:[%s1934_s7 + $0x60] sm:$0xff] %vm53_vm0, %v1456_v14  ;;  %v532_v25 = vand.u32 2147483647, %v1456_v14  ;;  %v1470_v27 = vadd.f32 %v1081_v17, %v1331_v13  ;;  %1119 = vlog2.f32 %v611_v19  ;;  %v572_v30 = vmul.f32 1.442695, %v546_v11 }
 0x1b0   :  { %v463_v28 = vpop.f32.mrf.mxu1  ;;  %v549_v32 = vsub.f32 0.0, %v533_v12  ;;  %1121 = vpow2.f32 %v570_v16  ;;  %v602_v47 = vadd.f32 1.0, %v1472_v29  ;;  %v615_v58 = vadd.f32 1.0, %v614_v41 }
 0x1b1   :  { %v1475_v33 = vadd.f32 %v1331_v13, %v463_v28  ;;  %903 = vst.msk [vmem:[%s1934_s7 + $0x78] sm:$0xff] %vm53_vm0, %v1470_v27  ;;  %v535_v39 = vand.u32 2147483647, %v1470_v27  ;;  %v599_v13 = vand.u32 2147483647, %v1420_v60  ;;  %v548_v46 = vsub.f32 0.0, %v532_v25 }
 0x1b2   :  { %v1495_v43 = vpop.eup %1107  ;;  %1123 = vlog2.f32 %v584_v37  ;;  %v578_v48 = vmul.f32 1.442695, %v549_v32  ;;  %v617_v3 = vand.u32 2147483647, %v1446_v7  ;;  %v598_v5 = vmul.f32 %v1420_v60, %v597_v49 }
 0x1b3   :  { %902 = vst.msk [vmem:[%s1934_s7 + $0x70] sm:$0xff] %vm53_vm0, %v1475_v33  ;;  %1125 = vpow2.f32 %v572_v30  ;;  %v1499_v52 = vpop.eup %1109  ;;  %v534_v53 = vand.u32 2147483647, %v1475_v33  ;;  %v551_v57 = vsub.f32 0.0, %v535_v39  ;;  %v620_v61 = vadd.f32 1.0, %v1495_v43  ;;  %s1163_s7 = smov 96  }
 0x1b4   :  { %1127 = vlog2.f32 %v602_v47  ;;  %v576_v1 = vmul.f32 1.442695, %v548_v46  ;;  %vm1510_vm3 = vcmp.lt.f32.partialorder %v599_v13, 0.0004427343  ;;  %v587_v8 = vmul.f32 -0.5, %v1459_v20 }
 0x1b5   :  { %1129 = vpow2.f32 %v574_v44  ;;  %v629_v9 = vadd.f32 1.0, %v1499_v52  ;;  %v550_v10 = vsub.f32 0.0, %v534_v53  ;;  %v605_v12 = vmul.f32 -0.5, %v1472_v29 }
 0x1b6   :  { %v1508_v0 = vpop.eup %1111  ;;  %1131 = vpow2.f32 %v578_v48  ;;  %v582_v17 = vmul.f32 1.442695, %v551_v57  ;;  %v616_v19 = vmul.f32 %v1446_v7, %v615_v58  ;;  %vm1529_vm5 = vcmp.lt.f32.partialorder %v617_v3, 0.0004427343 }
 0x1b7   :  { %1133 = vlog2.f32 %v620_v61  ;;  %v638_v60 = vadd.f32 1.0, %v1508_v0  ;;  %v590_v30 = vand.u32 2147483647, %v1459_v20  ;;  %v588_v7 = vadd.f32 1.0, %v587_v8 }
 0x1b8   :  { %v1114_v4 = vpop.eup %1113  ;;  %1135 = vlog2.f32 %v629_v9  ;;  %v608_v37 = vand.u32 2147483647, %v1472_v29  ;;  %v580_v39 = vmul.f32 1.442695, %v550_v10  ;;  %v606_v41 = vadd.f32 1.0, %v605_v12 }
 0x1b9   :  { %v595_v11 = vmul.f32 0.6931472, %v1114_v4  ;;  %v1521_v16 = vpop.eup %1115  ;;  %1137 = vpow2.f32 %v576_v1  ;;  %v623_v47 = vmul.f32 -0.5, %v1495_v43  ;;  %vm1551_vm7 = vcmp.lt.f32.partialorder %v590_v30, 0.0004427343 }
 0x1ba   :  { %1139 = vlog2.f32 %v638_v60  ;;  %v647_v44 = vadd.f32 1.0, %v1521_v16  ;;  %v632_v57 = vmul.f32 -0.5, %v1499_v52  ;;  %v589_v1 = vmul.f32 %v1459_v20, %v588_v7 }
 0x1bb   :  { %v1525_v24 = vpop.eup %1117  ;;  %v601_v25 = vsel %vm1510_vm3, %v598_v5, %v595_v11  ;;  %1141 = vpow2.f32 %v582_v17  ;;  %v626_v2 = vand.u32 2147483647, %v1495_v43  ;;  %vm1564_vm9 = vcmp.lt.f32.partialorder %v608_v37, 0.0004427343 }
 0x1bc   :  { %v1120_v32 = vpop.eup %1119  ;;  %v729_v34 = vadd.f32 %v601_v25, %v473_v21  ;;  %v656_v48 = vadd.f32 1.0, %v1525_v24  ;;  %1143 = vlog2.f32 %v647_v44  ;;  %v641_v8 = vmul.f32 -0.5, %v1508_v0 }
 0x1bd   :  { %v613_v13 = vmul.f32 0.6931472, %v1120_v32  ;;  %v1540_v46 = vpop.eup %1121  ;;  %v624_v11 = vadd.f32 1.0, %v623_v47  ;;  %v635_v60 = vand.u32 2147483647, %v1499_v52  ;;  %v650_v30 = vmul.f32 -0.5, %v1521_v16 }
 0x1be   :  { %v745_v21 = vsel %vm489_vm2, %v1334_v15, %v729_v34  ;;  %1145 = vlog2.f32 %v656_v48  ;;  %v665_v9 = vadd.f32 1.0, %v1540_v46  ;;  %vm1585_vm11 = vcmp.lt.f32.partialorder %v626_v2, 0.0004427343 }
 0x1bf   :  { %794 = vrot.lane.b32.xlu0 %v745_v21, %s1163_s7  ;;  %v619_v49 = vsel %vm1529_vm5, %v616_v19, %v613_v13  ;;  %v1124_v58 = vpop.eup %1123  ;;  %1147 = vpow2.f32 %v580_v39  ;;  %v633_v19 = vadd.f32 1.0, %v632_v57  ;;  %v642_v7 = vadd.f32 1.0, %v641_v8 }
 0x1c0   :  { %v731_v61 = vadd.f32 %v619_v49, %v475_v36  ;;  %v1562_v3 = vpop.eup %1125  ;;  %v586_v4 = vmul.f32 0.6931472, %v1124_v58  ;;  %v607_v36 = vmul.f32 %v1472_v29, %v606_v41  ;;  %1149 = vlog2.f32 %v665_v9 }
 0x1c1   :  { %v1128_v10 = vpop.eup %1127  ;;  %v659_v37 = vmul.f32 -0.5, %v1525_v24  ;;  %v625_v44 = vmul.f32 %v1495_v43, %v624_v11  ;;  %v644_v21 = vand.u32 2147483647, %v1508_v0  ;;  %v634_v49 = vmul.f32 %v1499_v52, %v633_v19 }
 0x1c2   :  { %v747_v20 = vsel %vm491_vm4, %v1352_v22, %v731_v61  ;;  %v592_v12 = vsel %vm1551_vm7, %v589_v1, %v586_v4  ;;  %v604_v17 = vmul.f32 0.6931472, %v1128_v10  ;;  %v1581_v25 = vpop.eup %1129  ;;  %vm1610_vm14 = vcmp.lt.f32.partialorder %v635_v60, 0.0004427343 }
 0x1c3   :  { %798 = vrot.lane.b32.xlu1 %v747_v20, %s1163_s7  ;;  %v728_v28 = vadd.f32 %v592_v12, %v472_v23  ;;  %v1592_v32 = vpop.eup %1131  ;;  %v674_v23 = vadd.f32 1.0, %v1562_v3  ;;  %v651_v58 = vadd.f32 1.0, %v650_v30  ;;  %v653_v61 = vand.u32 2147483647, %v1521_v16 }
 0x1c4   :  { %v610_v34 = vsel %vm1564_vm9, %v607_v36, %v604_v17  ;;  %v1134_v39 = vpop.eup %1133  ;;  %v643_v2 = vmul.f32 %v1508_v0, %v642_v7  ;;  %v660_v4 = vadd.f32 1.0, %v659_v37  ;;  %v683_v5 = vadd.f32 1.0, %v1581_v25 }
 0x1c5   :  { %v744_v13 = vsel %vm488_vm6, %v1343_v18, %v728_v28  ;;  %v730_v41 = vadd.f32 %v610_v34, %v474_v38  ;;  %v1136_v47 = vpop.eup %1135  ;;  %v622_v48 = vmul.f32 0.6931472, %v1134_v39  ;;  %1151 = vlog2.f32 %v674_v23 }
 0x1c6   :  { %792 = vrot.lane.b32.xlu0 %v744_v13, %s1163_s7  ;;  %v1614_v57 = vpop.eup %1137  ;;  %v631_v43 = vmul.f32 0.6931472, %v1136_v47  ;;  %v668_v20 = vmul.f32 -0.5, %v1540_v46  ;;  %vm645_vm1 = vcmp.lt.f32.partialorder %v644_v21, 0.0004427343  ;;  %1153 = vlog2.f32 %v683_v5 }
 0x1c7   :  { %v746_v38 = vsel %vm490_vm8, %v1361_v26, %v730_v41  ;;  %v1140_v1 = vpop.eup %1139  ;;  %v628_v52 = vsel %vm1585_vm11, %v625_v44, %v622_v48  ;;  %v662_v11 = vand.u32 2147483647, %v1525_v24  ;;  %v652_v19 = vmul.f32 %v1521_v16, %v651_v58 }
 0x1c8   :  { %796 = vrot.lane.b32.xlu1 %v746_v38, %s1163_s7  ;;  %v732_v8 = vadd.f32 %v628_v52, %v476_v51  ;;  %v637_v9 = vsel %vm1610_vm14, %v634_v49, %v631_v43  ;;  %v640_v10 = vmul.f32 0.6931472, %v1140_v1  ;;  %v1633_v36 = vpop.eup %1141  ;;  %vm1643_vm2 = vcmp.lt.f32.partialorder %v653_v61, 0.0004427343 }
 0x1c9   :  { %v733_v0 = vadd.f32 %v637_v9, %v477_v42  ;;  %v1144_v12 = vpop.eup %1143  ;;  %v677_v34 = vmul.f32 -0.5, %v1562_v3  ;;  %v661_v7 = vmul.f32 %v1525_v24, %v660_v4  ;;  %v669_v37 = vadd.f32 1.0, %v668_v20 }
 0x1ca   :  { %v748_v51 = vsel %vm492_vm10, %v1373_v35, %v732_v8  ;;  %v646_v17 = vsel %vm645_vm1, %v643_v2, %v640_v10  ;;  %v649_v30 = vmul.f32 0.6931472, %v1144_v12  ;;  %v692_v23 = vadd.f32 1.0, %v1614_v57 }
 0x1cb   :  { %v1146_v28 = vpop.eup %1145  ;;  %800 = vrot.lane.b32.xlu0 %v748_v51, %s1163_s7  ;;  %v749_v42 = vsel %vm493_vm12, %v1370_v31, %v733_v0  ;;  %v734_v29 = vadd.f32 %v646_v17, %v478_v54  ;;  %vm663_vm3 = vcmp.lt.f32.partialorder %v662_v11, 0.0004427343  ;;  %v671_v41 = vand.u32 2147483647, %v1540_v46 }
 0x1cc   :  { %802 = vrot.lane.b32.xlu1 %v749_v42, %s1163_s7  ;;  %v658_v16 = vmul.f32 0.6931472, %v1146_v28  ;;  %v1658_v39 = vpop.eup %1147  ;;  %v655_v54 = vsel %vm1643_vm2, %v652_v19, %v649_v30  ;;  %vm496_vm4 = vcmp.ne.f32.partialorder %v1415_v56, %v1415_v56  ;;  %1155 = vlog2.f32 %v692_v23 }
 0x1cd   :  { %v750_v13 = vsel %vm494_vm13, %v1396_v45, %v734_v29  ;;  %v735_v44 = vadd.f32 %v655_v54, %v479_v55  ;;  %v1150_v21 = vpop.eup %1149  ;;  %v678_v48 = vadd.f32 1.0, %v677_v34  ;;  %v686_v49 = vmul.f32 -0.5, %v1581_v25 }
 0x1ce   :  { %v664_v24 = vsel %vm663_vm3, %v661_v7, %v658_v16  ;;  %v701_v53 = vadd.f32 1.0, %v1592_v32  ;;  %v667_v38 = vmul.f32 0.6931472, %v1150_v21  ;;  %v670_v43 = vmul.f32 %v1540_v46, %v669_v37 }
 0x1cf   :  { %804 = vrot.lane.b32.xlu0 %v750_v13, %s1163_s7  ;;  %v736_v47 = vadd.f32 %v664_v24, %v480_v62  ;;  %v751_v55 = vsel %vm495_vm15, %v1388_v40, %v735_v44  ;;  %v680_v58 = vand.u32 2147483647, %v1562_v3  ;;  %v481_v62 = vmax.f32 %v1406_v50, 0.0 }
 0x1d0   :  { %806 = vrot.lane.b32.xlu1 %v751_v55, %s1163_s7  ;;  %vm672_vm5 = vcmp.lt.f32.partialorder %v671_v41, 0.0004427343  ;;  %1157 = vlog2.f32 %v701_v53  ;;  %vm497_vm6 = vcmp.ne.f32.partialorder %v1406_v50, %v1406_v50  ;;  %v482_v2 = vmax.f32 %v1434_v63, 0.0 }
 0x1d1   :  { %v752_v61 = vsel %vm496_vm4, %v1415_v56, %v736_v47  ;;  %v673_v52 = vsel %vm672_vm5, %v670_v43, %v667_v38  ;;  %v710_v4 = vadd.f32 1.0, %v1658_v39  ;;  %v679_v8 = vmul.f32 %v1562_v3, %v678_v48 }
 0x1d2   :  { %v1152_v1 = vpop.eup %1151  ;;  %v737_v46 = vadd.f32 %v673_v52, %v481_v62  ;;  %v687_v9 = vadd.f32 1.0, %v686_v49  ;;  %vm681_vm7 = vcmp.lt.f32.partialorder %v680_v58, 0.0004427343  ;;  %v689_v10 = vand.u32 2147483647, %v1581_v25 }
 0x1d3   :  { %808 = vrot.lane.b32.xlu0 %v752_v61, %s1163_s7  ;;  %v676_v5 = vmul.f32 0.6931472, %v1152_v1  ;;  %v695_v20 = vmul.f32 -0.5, %v1614_v57  ;;  %1159 = vlog2.f32 %v710_v4  ;;  %v1154_v12 = vpop.eup %1153  ;;  %vm498_vm8 = vcmp.ne.f32.partialorder %v1434_v63, %v1434_v63 }
 0x1d4   :  { %v753_v0 = vsel %vm497_vm6, %v1406_v50, %v737_v46  ;;  %v719_v17 = vadd.f32 1.0, %v1633_v36  ;;  %v483_v3 = vmax.f32 %v1418_v59, 0.0  ;;  %v685_v19 = vmul.f32 0.6931472, %v1154_v12 }
 0x1d5   :  { %v682_v11 = vsel %vm681_vm7, %v679_v8, %v676_v5  ;;  %810 = vrot.lane.b32.xlu1 %v753_v0, %s1163_s7  ;;  %v688_v60 = vmul.f32 %v1581_v25, %v687_v9  ;;  %v704_v28 = vmul.f32 -0.5, %v1592_v32  ;;  %vm690_vm9 = vcmp.lt.f32.partialorder %v689_v10, 0.0004427343 }
 0x1d6   :  { %v738_v51 = vadd.f32 %v682_v11, %v482_v2  ;;  %v696_v29 = vadd.f32 1.0, %v695_v20  ;;  %1161 = vlog2.f32 %v719_v17  ;;  %v698_v34 = vand.u32 2147483647, %v1614_v57 }
 0x1d7   :  { %v691_v30 = vsel %vm690_vm9, %v688_v60, %v685_v19  ;;  %v713_v7 = vmul.f32 -0.5, %v1658_v39  ;;  %vm499_vm10 = vcmp.ne.f32.partialorder %v1418_v59, %v1418_v59  ;;  %v705_v25 = vadd.f32 1.0, %v704_v28  ;;  %v763_v19 = vld [vmem:[%s1935_s5 + $0x18] sm:$0xff] }
 0x1d8   :  { %v754_v42 = vsel %vm498_vm8, %v1434_v63, %v738_v51  ;;  %v739_v16 = vadd.f32 %v691_v30, %v483_v3  ;;  %v697_v54 = vmul.f32 %v1614_v57, %v696_v29  ;;  %v707_v41 = vand.u32 2147483647, %v1592_v32  ;;  %v760_v29 = vld [vmem:[%s1935_s5] sm:$0xff] }
 0x1d9   :  { %812 = vrot.lane.b32.xlu0 %v754_v42, %s1163_s7  ;;  %v1156_v37 = vpop.eup %1155  ;;  %v484_v44 = vmax.f32 %v1456_v14, 0.0  ;;  %vm699_vm11 = vcmp.lt.f32.partialorder %v698_v34, 0.0004427343  ;;  %v714_v47 = vadd.f32 1.0, %v713_v7  ;;  %v722_v48 = vmul.f32 -0.5, %v1633_v36 }
 0x1da   :  { %v755_v23 = vsel %vm499_vm10, %v1418_v59, %v739_v16  ;;  %v694_v13 = vmul.f32 0.6931472, %v1156_v37  ;;  %v706_v55 = vmul.f32 %v1592_v32, %v705_v25  ;;  %v716_v38 = vand.u32 2147483647, %v1658_v39  ;;  %v764_v25 = vld [vmem:[%s1935_s5 + $0x20] sm:$0xff] }
 0x1db   :  { %814 = vrot.lane.b32.xlu1 %v755_v23, %s1163_s7  ;;  %vm500_vm12 = vcmp.ne.f32.partialorder %v1456_v14, %v1456_v14  ;;  %v485_v57 = vmax.f32 %v1444_v6, 0.0  ;;  %vm708_vm13 = vcmp.lt.f32.partialorder %v707_v41, 0.0004427343  ;;  %v715_v52 = vmul.f32 %v1658_v39, %v714_v47 }
 0x1dc   :  { %v700_v21 = vsel %vm699_vm11, %v697_v54, %v694_v13  ;;  %v723_v2 = vadd.f32 1.0, %v722_v48  ;;  %vm501_vm14 = vcmp.ne.f32.partialorder %v1444_v6, %v1444_v6  ;;  %v486_v32 = vmax.f32 %v1475_v33, 0.0  ;;  %v767_v48 = vld [vmem:[%s1935_s5 + $0x38] sm:$0xff] }
 0x1dd   :  { %v1158_v24 = vpop.eup %1157  ;;  %v740_v49 = vadd.f32 %v700_v21, %v484_v44  ;;  %vm717_vm15 = vcmp.lt.f32.partialorder %v716_v38, 0.0004427343  ;;  %v725_v4 = vand.u32 2147483647, %v1633_v36  ;;  %vm502_vm1 = vcmp.ne.f32.partialorder %v1475_v33, %v1475_v33 }
 0x1de   :  { %v703_v53 = vmul.f32 0.6931472, %v1158_v24  ;;  %v724_v10 = vmul.f32 %v1633_v36, %v723_v2  ;;  %v487_v0 = vmax.f32 %v1470_v27, 0.0  ;;  %vm503_vm3 = vcmp.ne.f32.partialorder %v1470_v27, %v1470_v27  ;;  %v761_v36 = vld [vmem:[%s1935_s5 + $0x8] sm:$0xff]  ;;  %v771_v2 = vld [vmem:[%s1935_s5 + $0x58] sm:$0xff] }
 0x1df   :  { %v756_v58 = vsel %vm500_vm12, %v1456_v14, %v740_v49  ;;  %vm726_vm2 = vcmp.lt.f32.partialorder %v725_v4, 0.0004427343 }
 0x1e0   :  { %v1160_v43 = vpop.eup %1159  ;;  %v709_v61 = vsel %vm708_vm13, %v706_v55, %v703_v53  ;;  %816 = vrot.lane.b32.xlu0 %v756_v58, %s1163_s7 }
 0x1e1   :  { %v741_v62 = vadd.f32 %v709_v61, %v485_v57  ;;  %v712_v1 = vmul.f32 0.6931472, %v1160_v43 }
 0x1e3   :  { %v757_v46 = vsel %vm501_vm14, %v1444_v6, %v741_v62  ;;  %v718_v5 = vsel %vm717_vm15, %v715_v52, %v712_v1  ;;  %v1162_v8 = vpop.eup %1161 }
 0x1e4   :  { %818 = vrot.lane.b32.xlu1 %v757_v46, %s1163_s7  ;;  %v742_v9 = vadd.f32 %v718_v5, %v486_v32  ;;  %v721_v39 = vmul.f32 0.6931472, %v1162_v8  ;;  %v772_v5 = vld [vmem:[%s1935_s5 + $0x60] sm:$0xff] }
 0x1e6   :  { %v758_v20 = vsel %vm502_vm1, %v1475_v33, %v742_v9  ;;  %v727_v11 = vsel %vm726_vm2, %v724_v10, %v721_v39 }
 0x1e7   :  { %820 = vrot.lane.b32.xlu0 %v758_v20, %s1163_s7  ;;  %v743_v12 = vadd.f32 %v727_v11, %v487_v0  ;;  %v774_v20 = vld [vmem:[%s1935_s5 + $0x70] sm:$0xff] }
 0x1e9   :  { %v759_v51 = vsel %vm503_vm3, %v1470_v27, %v743_v12  ;;  %v775_v12 = vld [vmem:[%s1935_s5 + $0x78] sm:$0xff] }
 0x1ea   :  { %822 = vrot.lane.b32.xlu1 %v759_v51, %s1163_s7 }
 0x231   :  { %v795_v17 = vpop.permute.xlu0 %794 }
 0x232   :  { %v841_v3 = vmul.f32 %v795_v17, %v761_v36  ;;  %905 = vst.msk [vmem:[%s1936_s8 + $0x8] sm:$0xff] %vm53_vm0, %v795_v17 }
 0x234   :  { %v857_v60 = vadd.f32 %v841_v3, %v1334_v15  ;;  %v762_v15 = vld [vmem:[%s1935_s5 + $0x10] sm:$0xff] }
 0x235   :  { %v799_v28 = vpop.permute.xlu1 %798 }
 0x236   :  { %873 = vst.msk [vmem:[%s1937_s6 + $0x8] sm:$0xff] %vm53_vm0, %v857_v60  ;;  %v843_v42 = vmul.f32 %v799_v28, %v763_v19  ;;  %907 = vst.msk [vmem:[%s1936_s8 + $0x18] sm:$0xff] %vm53_vm0, %v799_v28 }
 0x238   :  { %v859_v30 = vadd.f32 %v843_v42, %v1352_v22  ;;  %v793_v34 = vpop.permute.xlu0 %792 }
 0x239   :  { %v840_v16 = vmul.f32 %v793_v34, %v760_v29  ;;  %904 = vst.msk [vmem:[%s1936_s8] sm:$0xff] %vm53_vm0, %v793_v34 }
 0x23a   :  { %875 = vst.msk [vmem:[%s1937_s6 + $0x18] sm:$0xff] %vm53_vm0, %v859_v30  ;;  %v797_v7 = vpop.permute.xlu1 %796 }
 0x23b   :  { %v856_v37 = vadd.f32 %v840_v16, %v1343_v18  ;;  %v842_v22 = vmul.f32 %v797_v7, %v762_v15  ;;  %906 = vst.msk [vmem:[%s1936_s8 + $0x10] sm:$0xff] %vm53_vm0, %v797_v7  ;;  %v765_v18 = vld [vmem:[%s1935_s5 + $0x28] sm:$0xff] }
 0x23d   :  { %872 = vst.msk [vmem:[%s1937_s6] sm:$0xff] %vm53_vm0, %v856_v37  ;;  %v858_v23 = vadd.f32 %v842_v22, %v1361_v26  ;;  %v801_v13 = vpop.permute.xlu0 %800  ;;  %v766_v26 = vld [vmem:[%s1935_s5 + $0x30] sm:$0xff] }
 0x23e   :  { %v844_v54 = vmul.f32 %v801_v13, %v764_v25  ;;  %908 = vst.msk [vmem:[%s1936_s8 + $0x20] sm:$0xff] %vm53_vm0, %v801_v13  ;;  %v803_v41 = vpop.permute.xlu1 %802 }
 0x23f   :  { %874 = vst.msk [vmem:[%s1937_s6 + $0x10] sm:$0xff] %vm53_vm0, %v858_v23  ;;  %v845_v44 = vmul.f32 %v803_v41, %v765_v18  ;;  %909 = vst.msk [vmem:[%s1936_s8 + $0x28] sm:$0xff] %vm53_vm0, %v803_v41 }
 0x240   :  { %v860_v24 = vadd.f32 %v844_v54, %v1373_v35  ;;  %v768_v35 = vld [vmem:[%s1935_s5 + $0x40] sm:$0xff] }
 0x241   :  { %v861_v21 = vadd.f32 %v845_v44, %v1370_v31  ;;  %v805_v47 = vpop.permute.xlu0 %804 }
 0x242   :  { %876 = vst.msk [vmem:[%s1937_s6 + $0x20] sm:$0xff] %vm53_vm0, %v860_v24  ;;  %v846_v49 = vmul.f32 %v805_v47, %v766_v26  ;;  %910 = vst.msk [vmem:[%s1936_s8 + $0x30] sm:$0xff] %vm53_vm0, %v805_v47  ;;  %v807_v31 = vpop.permute.xlu1 %806 }
 0x243   :  { %877 = vst.msk [vmem:[%s1937_s6 + $0x28] sm:$0xff] %vm53_vm0, %v861_v21  ;;  %v847_v55 = vmul.f32 %v807_v31, %v767_v48  ;;  %911 = vst.msk [vmem:[%s1936_s8 + $0x38] sm:$0xff] %vm53_vm0, %v807_v31 }
 0x244   :  { %v862_v53 = vadd.f32 %v846_v49, %v1396_v45  ;;  %v769_v45 = vld [vmem:[%s1935_s5 + $0x48] sm:$0xff] }
 0x245   :  { %v809_v38 = vpop.permute.xlu0 %808  ;;  %v863_v57 = vadd.f32 %v847_v55, %v1388_v40  ;;  %v770_v40 = vld [vmem:[%s1935_s5 + $0x50] sm:$0xff] }
 0x246   :  { %878 = vst.msk [vmem:[%s1937_s6 + $0x30] sm:$0xff] %vm53_vm0, %v862_v53  ;;  %v848_v43 = vmul.f32 %v809_v38, %v768_v35  ;;  %912 = vst.msk [vmem:[%s1936_s8 + $0x40] sm:$0xff] %vm53_vm0, %v809_v38 }
 0x247   :  { %879 = vst.msk [vmem:[%s1937_s6 + $0x38] sm:$0xff] %vm53_vm0, %v863_v57  ;;  %v811_v61 = vpop.permute.xlu1 %810 }
 0x248   :  { %v864_v58 = vadd.f32 %v848_v43, %v1415_v56  ;;  %v849_v62 = vmul.f32 %v811_v61, %v769_v45  ;;  %913 = vst.msk [vmem:[%s1936_s8 + $0x48] sm:$0xff] %vm53_vm0, %v811_v61 }
 0x24a   :  { %880 = vst.msk [vmem:[%s1937_s6 + $0x40] sm:$0xff] %vm53_vm0, %v864_v58  ;;  %v865_v1 = vadd.f32 %v849_v62, %v1406_v50 }
 0x24b   :  { %v813_v52 = vpop.permute.xlu0 %812 }
 0x24c   :  { %v850_v56 = vmul.f32 %v813_v52, %v770_v40  ;;  %914 = vst.msk [vmem:[%s1936_s8 + $0x50] sm:$0xff] %vm53_vm0, %v813_v52  ;;  %881 = vst.msk [vmem:[%s1937_s6 + $0x48] sm:$0xff] %vm53_vm0, %v865_v1 }
 0x24d   :  { %v815_v4 = vpop.permute.xlu1 %814 }
 0x24e   :  { %v866_v32 = vadd.f32 %v850_v56, %v1434_v63  ;;  %v851_v50 = vmul.f32 %v815_v4, %v771_v2  ;;  %915 = vst.msk [vmem:[%s1936_s8 + $0x58] sm:$0xff] %vm53_vm0, %v815_v4 }
 0x250   :  { %882 = vst.msk [vmem:[%s1937_s6 + $0x50] sm:$0xff] %vm53_vm0, %v866_v32  ;;  %v867_v46 = vadd.f32 %v851_v50, %v1418_v59  ;;  %v773_v59 = vld [vmem:[%s1935_s5 + $0x68] sm:$0xff] }
 0x252   :  { %883 = vst.msk [vmem:[%s1937_s6 + $0x58] sm:$0xff] %vm53_vm0, %v867_v46  ;;  %v817_v63 = vpop.permute.xlu0 %816 }
 0x253   :  { %v852_v8 = vmul.f32 %v817_v63, %v772_v5  ;;  %916 = vst.msk [vmem:[%s1936_s8 + $0x60] sm:$0xff] %vm53_vm0, %v817_v63 }
 0x255   :  { %v868_v9 = vadd.f32 %v852_v8, %v1456_v14 }
 0x256   :  { %v819_v39 = vpop.permute.xlu1 %818 }
 0x257   :  { %v853_v10 = vmul.f32 %v819_v39, %v773_v59  ;;  %917 = vst.msk [vmem:[%s1936_s8 + $0x68] sm:$0xff] %vm53_vm0, %v819_v39  ;;  %884 = vst.msk [vmem:[%s1937_s6 + $0x60] sm:$0xff] %vm53_vm0, %v868_v9 }
 0x259   :  { %v869_v0 = vadd.f32 %v853_v10, %v1444_v6  ;;  %v821_v11 = vpop.permute.xlu0 %820 }
 0x25a   :  { %v854_v14 = vmul.f32 %v821_v11, %v774_v20  ;;  %918 = vst.msk [vmem:[%s1936_s8 + $0x70] sm:$0xff] %vm53_vm0, %v821_v11 }
 0x25b   :  { %885 = vst.msk [vmem:[%s1937_s6 + $0x68] sm:$0xff] %vm53_vm0, %v869_v0 }
 0x25c   :  { %v870_v51 = vadd.f32 %v854_v14, %v1475_v33  ;;  %v823_v36 = vpop.permute.xlu1 %822 }
 0x25d   :  { %v855_v6 = vmul.f32 %v823_v36, %v775_v12  ;;  %919 = vst.msk [vmem:[%s1936_s8 + $0x78] sm:$0xff] %vm53_vm0, %v823_v36 }
 0x25e   :  { %886 = vst.msk [vmem:[%s1937_s6 + $0x70] sm:$0xff] %vm53_vm0, %v870_v51 }
 0x25f   :  { %v871_v17 = vadd.f32 %v855_v6, %v1470_v27 }
 0x261   :  { %887 = vst.msk [vmem:[%s1937_s6 + $0x78] sm:$0xff] %vm53_vm0, %v871_v17 }

// kernel: vgae_encoder_forward.3
= control target key start
LH: loop header
LB: loop body
LE: loop exit
PB: predicated region body
PF: predicated region fallthrough
CT: control target
= control target key end

     0   :  { %vm21_vm0 = vcmask 261120   ;;  %v597_v1 = vmov 0.0   ;;  %vm395_vm1 = vcmask 257024   ;;  %s879_s1 = inlined_call_operand.vmem [shape: bf16[128,32], index: 1, kind: input, shape index: {}]   ;;  %s880_s0 = inlined_call_operand.vmem [shape: bf16[128,128], index: 0, kind: input, shape index: {}]   ;;  %s881_s2 = inlined_call_operand.vmem [shape: f32[128,32], index: 2, kind: input, shape index: {}]   ;;  %s882_s3 = inlined_call_operand.vmem [shape: bf16[128,32], index: 3, kind: output, shape index: {0}]   ;;  %s883_s4 = inlined_call_operand.vmem [shape: f32[128,32], index: 4, kind: output, shape index: {1}]  }
   0x1   :  { %v581_v0 = vld [vmem:[%s879_s1 + $0x38] sm:$0xff]   ;;  %24 = vst.msk [vmem:[#allocation2 + $0x10] sm:$0xff] %vm21_vm0, %v597_v1  ;;  %22 = vst.msk [vmem:[#allocation2] sm:$0xff] %vm21_vm0, %v597_v1  ;;  %v582_v2 = vld [vmem:[%s879_s1 + $0x30] sm:$0xff]  }
   0x2   :  { %23 = vst.msk [vmem:[#allocation2 + $0x8] sm:$0xff] %vm21_vm0, %v597_v1  ;;  %25 = vst.msk [vmem:[#allocation2 + $0x18] sm:$0xff] %vm21_vm0, %v597_v1  ;;  %532 = vmatprep.subr.bf16.mxu0 %v581_v0  ;;  %564 = vmatprep.subr.bf16.mxu1 %v581_v0  ;;  %v583_v3 = vld [vmem:[%s879_s1 + $0x28] sm:$0xff]   ;;  %v584_v4 = vld [vmem:[%s879_s1 + $0x20] sm:$0xff]  }
   0x3   :  { %26 = vst.msk [vmem:[#allocation2 + $0x20] sm:$0xff] %vm21_vm0, %v597_v1  ;;  %27 = vst.msk [vmem:[#allocation2 + $0x28] sm:$0xff] %vm21_vm0, %v597_v1  ;;  %533 = vmatpush3.bf16.msra.mxu0 %v581_v0  ;;  %572 = vmatpush3.bf16.msra.mxu1 %v581_v0  ;;  %v589_v5 = vld [vmem:[%s880_s0] sm:$0xff]   ;;  %v585_v7 = vld [vmem:[%s879_s1 + $0x18] sm:$0xff]  }
   0x4   :  { %28 = vst.msk [vmem:[#allocation2 + $0x30] sm:$0xff] %vm21_vm0, %v597_v1  ;;  %29 = vst.msk [vmem:[#allocation2 + $0x38] sm:$0xff] %vm21_vm0, %v597_v1  ;;  %534 = vmatprep.subr.bf16.mxu0 %v582_v2  ;;  %565 = vmatprep.subr.bf16.mxu1 %v582_v2  ;;  %v590_v6 = vld [vmem:[%s880_s0 + $0x20] sm:$0xff]   ;;  %v586_v8 = vld [vmem:[%s879_s1 + $0x10] sm:$0xff]  }
   0x5   :  { %30 = vst.msk [vmem:[#allocation2 + $0x40] sm:$0xff] %vm21_vm0, %v597_v1  ;;  %31 = vst.msk [vmem:[#allocation2 + $0x48] sm:$0xff] %vm21_vm0, %v597_v1  ;;  %548 = vmatprep.mubr.bf16.mxu0 %v589_v5  ;;  %556 = vmatprep.mubr.bf16.mxu1 %v590_v6  ;;  %v587_v9 = vld [vmem:[%s879_s1 + $0x8] sm:$0xff]   ;;  %v588_v10 = vld [vmem:[%s879_s1] sm:$0xff]  }
   0x6   :  { %32 = vst.msk [vmem:[#allocation2 + $0x50] sm:$0xff] %vm21_vm0, %v597_v1  ;;  %33 = vst.msk [vmem:[#allocation2 + $0x58] sm:$0xff] %vm21_vm0, %v597_v1  ;;  %v591_v11 = vld [vmem:[%s880_s0 + $0x8] sm:$0xff]   ;;  %v593_v13 = vld [vmem:[%s880_s0 + $0x10] sm:$0xff]  }
   0x7   :  { %34 = vst.msk [vmem:[#allocation2 + $0x60] sm:$0xff] %vm21_vm0, %v597_v1  ;;  %35 = vst.msk [vmem:[#allocation2 + $0x68] sm:$0xff] %vm21_vm0, %v597_v1  ;;  %535 = vmatpush3.bf16.msra.mxu0 %v582_v2  ;;  %573 = vmatpush3.bf16.msra.mxu1 %v582_v2  ;;  %v592_v12 = vld [vmem:[%s880_s0 + $0x28] sm:$0xff]   ;;  %v594_v14 = vld [vmem:[%s880_s0 + $0x30] sm:$0xff]  }
   0x8   :  { %36 = vst.msk [vmem:[#allocation2 + $0x70] sm:$0xff] %vm21_vm0, %v597_v1  ;;  %37 = vst.msk [vmem:[#allocation2 + $0x78] sm:$0xff] %vm21_vm0, %v597_v1  ;;  %536 = vmatprep.subr.bf16.mxu0 %v583_v3  ;;  %566 = vmatprep.subr.bf16.mxu1 %v583_v3  ;;  %v595_v15 = vld [vmem:[%s880_s0 + $0x18] sm:$0xff]   ;;  %v40_v17 = vld [vmem:[#allocation2 + $0x10] sm:$0xff] }
   0x9   :  { %v596_v16 = vld [vmem:[%s880_s0 + $0x38] sm:$0xff]   ;;  %v38_v21 = vld [vmem:[#allocation2] sm:$0xff]  ;;  %v39_v33 = vld [vmem:[#allocation2 + $0x8] sm:$0xff] }
   0xa   :  { %v41_v27 = vld [vmem:[#allocation2 + $0x18] sm:$0xff]  ;;  %v414_v43 = vld [vmem:[%s881_s2 + $0x10] sm:$0xff]  ;;  %v412_v47 = vld [vmem:[%s881_s2] sm:$0xff] }
   0xb   :  { %537 = vmatpush3.bf16.msra.mxu0 %v583_v3  ;;  %574 = vmatpush3.bf16.msra.mxu1 %v583_v3  ;;  %v44_v39 = vld [vmem:[#allocation2 + $0x30] sm:$0xff]  ;;  %v42_v50 = vld [vmem:[#allocation2 + $0x20] sm:$0xff]  ;;  %v415_v61 = vld [vmem:[%s881_s2 + $0x18] sm:$0xff] }
   0xc   :  { %538 = vmatprep.subr.bf16.mxu0 %v584_v4  ;;  %567 = vmatprep.subr.bf16.mxu1 %v584_v4  ;;  %v46_v22 = vld [vmem:[#allocation2 + $0x40] sm:$0xff]  ;;  %v47_v34 = vld [vmem:[#allocation2 + $0x48] sm:$0xff]  ;;  %v422_v44 = vld [vmem:[%s881_s2 + $0x50] sm:$0xff] }
   0xd   :  { %v48_v18 = vld [vmem:[#allocation2 + $0x50] sm:$0xff]  ;;  %v49_v28 = vld [vmem:[#allocation2 + $0x58] sm:$0xff]  ;;  %v420_v54 = vld [vmem:[%s881_s2 + $0x40] sm:$0xff] }
   0xe   :  { %v50_v51 = vld [vmem:[#allocation2 + $0x60] sm:$0xff]  ;;  %v45_v62 = vld [vmem:[#allocation2 + $0x38] sm:$0xff] }
   0xf   :  { %539 = vmatpush3.bf16.msra.mxu0 %v584_v4  ;;  %575 = vmatpush3.bf16.msra.mxu1 %v584_v4  ;;  %v52_v40 = vld [vmem:[#allocation2 + $0x70] sm:$0xff]  ;;  %v53_v63 = vld [vmem:[#allocation2 + $0x78] sm:$0xff] }
  0x10   :  { %540 = vmatprep.subr.bf16.mxu0 %v585_v7  ;;  %568 = vmatprep.subr.bf16.mxu1 %v585_v7  ;;  %v423_v2 = vld [vmem:[%s881_s2 + $0x58] sm:$0xff] }
  0x13   :  { %541 = vmatpush3.bf16.msra.mxu0 %v585_v7  ;;  %576 = vmatpush3.bf16.msra.mxu1 %v585_v7 }
  0x14   :  { %542 = vmatprep.subr.bf16.mxu0 %v586_v8  ;;  %569 = vmatprep.subr.bf16.mxu1 %v586_v8 }
  0x17   :  { %543 = vmatpush3.bf16.msra.mxu0 %v586_v8  ;;  %577 = vmatpush3.bf16.msra.mxu1 %v586_v8 }
  0x18   :  { %544 = vmatprep.subr.bf16.mxu0 %v587_v9  ;;  %570 = vmatprep.subr.bf16.mxu1 %v587_v9 }
  0x1b   :  { %545 = vmatpush3.bf16.msra.mxu0 %v587_v9  ;;  %578 = vmatpush3.bf16.msra.mxu1 %v587_v9 }
  0x1c   :  { %546 = vmatprep.subr.bf16.mxu0 %v588_v10  ;;  %571 = vmatprep.subr.bf16.mxu1 %v588_v10 }
  0x1f   :  { %547 = vmatpush3.bf16.msra.mxu0 %v588_v10  ;;  %579 = vmatpush3.bf16.msra.mxu1 %v588_v10 }
  0x22   :  { %549 = vmatmul.mubr.bf16.vlgmr.msra.gmra.mxu0 %v591_v11  ;;  %557 = vmatmul.mubr.bf16.vlgmr.msra.gmra.mxu1 %v592_v12  ;;  %v413_v11 = vld [vmem:[%s881_s2 + $0x8] sm:$0xff] }
  0x23   :  { %552 = vmatprep.mubr.bf16.mxu0 %v593_v13  ;;  %560 = vmatprep.mubr.bf16.mxu1 %v594_v14  ;;  %v43_v12 = vld [vmem:[#allocation2 + $0x28] sm:$0xff] }
  0x24   :  { %v51_v13 = vld [vmem:[#allocation2 + $0x68] sm:$0xff] }
  0x2a   :  { %553 = vmatmul.mubr.bf16.gmra.mxu0 %v595_v15  ;;  %561 = vmatmul.mubr.bf16.gmra.mxu1 %v596_v16  ;;  %v421_v16 = vld [vmem:[%s881_s2 + $0x48] sm:$0xff] }
  0xe2   :  { %v550_v19 = vpop.f32.mrf.mxu0  ;;  %v558_v20 = vpop.f32.mrf.mxu1 }
  0xe3   :  { %v281_v23 = vadd.f32 %v550_v19, %v40_v17  ;;  %v289_v24 = vadd.f32 %v558_v20, %v48_v18 }
  0xe4   :  { %v216_v25 = vpop.f32.mrf.mxu0  ;;  %v248_v26 = vpop.f32.mrf.mxu1 }
  0xe5   :  { %298 = vst.msk [vmem:[#allocation2 + $0x10] sm:$0xff] %vm21_vm0, %v281_v23  ;;  %306 = vst.msk [vmem:[#allocation2 + $0x50] sm:$0xff] %vm21_vm0, %v289_v24  ;;  %v279_v29 = vadd.f32 %v216_v25, %v38_v21  ;;  %v287_v30 = vadd.f32 %v248_v26, %v46_v22  ;;  %v418_v25 = vld [vmem:[%s881_s2 + $0x30] sm:$0xff] }
  0xe6   :  { %v551_v31 = vpop.f32.mrf.mxu0  ;;  %v559_v32 = vpop.f32.mrf.mxu1 }
  0xe7   :  { %296 = vst.msk [vmem:[#allocation2] sm:$0xff] %vm21_vm0, %v279_v29  ;;  %304 = vst.msk [vmem:[#allocation2 + $0x40] sm:$0xff] %vm21_vm0, %v287_v30  ;;  %v282_v35 = vadd.f32 %v551_v31, %v41_v27  ;;  %v290_v36 = vadd.f32 %v559_v32, %v49_v28  ;;  %v426_v28 = vld [vmem:[%s881_s2 + $0x70] sm:$0xff] }
  0xe8   :  { %v219_v37 = vpop.f32.mrf.mxu0  ;;  %v251_v38 = vpop.f32.mrf.mxu1 }
  0xe9   :  { %299 = vst.msk [vmem:[#allocation2 + $0x18] sm:$0xff] %vm21_vm0, %v282_v35  ;;  %307 = vst.msk [vmem:[#allocation2 + $0x58] sm:$0xff] %vm21_vm0, %v290_v36  ;;  %v280_v41 = vadd.f32 %v219_v37, %v39_v33  ;;  %v288_v42 = vadd.f32 %v251_v38, %v47_v34 }
  0xea   :  { %v554_v45 = vpop.f32.mrf.mxu0  ;;  %v562_v46 = vpop.f32.mrf.mxu1 }
  0xeb   :  { %297 = vst.msk [vmem:[#allocation2 + $0x8] sm:$0xff] %vm21_vm0, %v280_v41  ;;  %305 = vst.msk [vmem:[#allocation2 + $0x48] sm:$0xff] %vm21_vm0, %v288_v42  ;;  %v285_v48 = vadd.f32 %v554_v45, %v44_v39  ;;  %v293_v49 = vadd.f32 %v562_v46, %v52_v40  ;;  %v416_v41 = vld [vmem:[%s881_s2 + $0x20] sm:$0xff]  ;;  %v427_v46 = vld [vmem:[%s881_s2 + $0x78] sm:$0xff] }
  0xec   :  { %v317_v52 = vld [vmem:[#allocation2 + $0x10] sm:$0xff]  ;;  %v232_v55 = vpop.f32.mrf.mxu0  ;;  %v264_v56 = vpop.f32.mrf.mxu1  ;;  %v424_v42 = vld [vmem:[%s881_s2 + $0x60] sm:$0xff] }
  0xed   :  { %v325_v53 = vld [vmem:[#allocation2 + $0x50] sm:$0xff]  ;;  %v502_v57 = vpack.c.bf16 %v317_v52, %v317_v52  ;;  %v430_v58 = vadd.f32 %v414_v43, %v317_v52  ;;  %302 = vst.msk [vmem:[#allocation2 + $0x30] sm:$0xff] %vm21_vm0, %v285_v48  ;;  %310 = vst.msk [vmem:[#allocation2 + $0x70] sm:$0xff] %vm21_vm0, %v293_v49  ;;  %v283_v3 = vadd.f32 %v232_v55, %v42_v50  ;;  %v419_v43 = vld [vmem:[%s881_s2 + $0x38] sm:$0xff] }
  0xee   :  { %v510_v59 = vpack.c.bf16 %v325_v53, %v325_v53  ;;  %v438_v60 = vadd.f32 %v422_v44, %v325_v53  ;;  %v315_v0 = vld [vmem:[#allocation2] sm:$0xff]  ;;  %v291_v4 = vadd.f32 %v264_v56, %v50_v51  ;;  %v555_v5 = vpop.f32.mrf.mxu0  ;;  %v563_v6 = vpop.f32.mrf.mxu1  ;;  %v417_v51 = vld [vmem:[%s881_s2 + $0x28] sm:$0xff] }
  0xef   :  { %v323_v1 = vld [vmem:[#allocation2 + $0x40] sm:$0xff]  ;;  %398 = vst.msk [vmem:[%s882_s3 + $0x8] sm:$0xf] %vm395_vm1, %v502_v57  ;;  %v500_v7 = vpack.c.bf16 %v315_v0, %v315_v0  ;;  %v428_v8 = vadd.f32 %v412_v47, %v315_v0  ;;  %v286_v17 = vadd.f32 %v555_v5, %v45_v62  ;;  %v294_v18 = vadd.f32 %v563_v6, %v53_v63 }
  0xf0   :  { %446 = vst.msk [vmem:[%s883_s4 + $0x10] sm:$0xff] %vm21_vm0, %v430_v58  ;;  %454 = vst.msk [vmem:[%s883_s4 + $0x50] sm:$0xff] %vm21_vm0, %v438_v60  ;;  %v508_v9 = vpack.c.bf16 %v323_v1, %v323_v1  ;;  %v436_v10 = vadd.f32 %v420_v54, %v323_v1  ;;  %v318_v14 = vld [vmem:[#allocation2 + $0x18] sm:$0xff]  ;;  %v235_v19 = vpop.f32.mrf.mxu0  ;;  %v267_v20 = vpop.f32.mrf.mxu1  ;;  %v425_v54 = vld [vmem:[%s881_s2 + $0x68] sm:$0xff] }
  0xf1   :  { %406 = vst.msk [vmem:[%s882_s3 + $0x28] sm:$0xf] %vm395_vm1, %v510_v59  ;;  %v326_v15 = vld [vmem:[#allocation2 + $0x58] sm:$0xff]  ;;  %396 = vst.msk [vmem:[%s882_s3] sm:$0xf] %vm395_vm1, %v500_v7  ;;  %v503_v21 = vpack.c.bf16 %v318_v14, %v318_v14  ;;  %v431_v22 = vadd.f32 %v415_v61, %v318_v14  ;;  %v284_v29 = vadd.f32 %v235_v19, %v43_v12 }
  0xf2   :  { %300 = vst.msk [vmem:[#allocation2 + $0x20] sm:$0xff] %vm21_vm0, %v283_v3  ;;  %308 = vst.msk [vmem:[#allocation2 + $0x60] sm:$0xff] %vm21_vm0, %v291_v4  ;;  %v511_v23 = vpack.c.bf16 %v326_v15, %v326_v15  ;;  %v439_v24 = vadd.f32 %v423_v2, %v326_v15  ;;  %v316_v26 = vld [vmem:[#allocation2 + $0x8] sm:$0xff]  ;;  %v292_v30 = vadd.f32 %v267_v20, %v51_v13 }
  0xf3   :  { %444 = vst.msk [vmem:[%s883_s4] sm:$0xff] %vm21_vm0, %v428_v8  ;;  %452 = vst.msk [vmem:[%s883_s4 + $0x40] sm:$0xff] %vm21_vm0, %v436_v10  ;;  %v324_v27 = vld [vmem:[#allocation2 + $0x48] sm:$0xff]  ;;  %v501_v31 = vpack.c.bf16 %v316_v26, %v316_v26  ;;  %v429_v32 = vadd.f32 %v413_v11, %v316_v26 }
  0xf4   :  { %404 = vst.msk [vmem:[%s882_s3 + $0x20] sm:$0xf] %vm395_vm1, %v508_v9  ;;  %399 = vst.msk [vmem:[%s882_s3 + $0xc] sm:$0xf] %vm395_vm1, %v503_v21  ;;  %v509_v33 = vpack.c.bf16 %v324_v27, %v324_v27  ;;  %v437_v34 = vadd.f32 %v421_v16, %v324_v27  ;;  %v321_v35 = vld [vmem:[#allocation2 + $0x30] sm:$0xff] }
  0xf5   :  { %303 = vst.msk [vmem:[#allocation2 + $0x38] sm:$0xff] %vm21_vm0, %v286_v17  ;;  %311 = vst.msk [vmem:[#allocation2 + $0x78] sm:$0xff] %vm21_vm0, %v294_v18  ;;  %v329_v36 = vld [vmem:[#allocation2 + $0x70] sm:$0xff]  ;;  %v506_v37 = vpack.c.bf16 %v321_v35, %v321_v35  ;;  %v434_v38 = vadd.f32 %v418_v25, %v321_v35 }
  0xf6   :  { %447 = vst.msk [vmem:[%s883_s4 + $0x18] sm:$0xff] %vm21_vm0, %v431_v22  ;;  %455 = vst.msk [vmem:[%s883_s4 + $0x58] sm:$0xff] %vm21_vm0, %v439_v24  ;;  %v514_v39 = vpack.c.bf16 %v329_v36, %v329_v36  ;;  %v442_v40 = vadd.f32 %v426_v28, %v329_v36 }
  0xf7   :  { %407 = vst.msk [vmem:[%s882_s3 + $0x2c] sm:$0xf] %vm395_vm1, %v511_v23  ;;  %397 = vst.msk [vmem:[%s882_s3 + $0x4] sm:$0xf] %vm395_vm1, %v501_v31 }
  0xf8   :  { %301 = vst.msk [vmem:[#allocation2 + $0x28] sm:$0xff] %vm21_vm0, %v284_v29  ;;  %309 = vst.msk [vmem:[#allocation2 + $0x68] sm:$0xff] %vm21_vm0, %v292_v30 }
  0xf9   :  { %445 = vst.msk [vmem:[%s883_s4 + $0x8] sm:$0xff] %vm21_vm0, %v429_v32  ;;  %453 = vst.msk [vmem:[%s883_s4 + $0x48] sm:$0xff] %vm21_vm0, %v437_v34  ;;  %v319_v44 = vld [vmem:[#allocation2 + $0x20] sm:$0xff] }
  0xfa   :  { %405 = vst.msk [vmem:[%s882_s3 + $0x24] sm:$0xf] %vm395_vm1, %v509_v33  ;;  %402 = vst.msk [vmem:[%s882_s3 + $0x18] sm:$0xf] %vm395_vm1, %v506_v37  ;;  %v327_v45 = vld [vmem:[#allocation2 + $0x60] sm:$0xff]  ;;  %v504_v47 = vpack.c.bf16 %v319_v44, %v319_v44  ;;  %v432_v48 = vadd.f32 %v416_v41, %v319_v44 }
  0xfb   :  { %450 = vst.msk [vmem:[%s883_s4 + $0x30] sm:$0xff] %vm21_vm0, %v434_v38  ;;  %458 = vst.msk [vmem:[%s883_s4 + $0x70] sm:$0xff] %vm21_vm0, %v442_v40  ;;  %v512_v49 = vpack.c.bf16 %v327_v45, %v327_v45  ;;  %v440_v50 = vadd.f32 %v424_v42, %v327_v45 }
  0xfc   :  { %410 = vst.msk [vmem:[%s882_s3 + $0x38] sm:$0xf] %vm395_vm1, %v514_v39  ;;  %v322_v52 = vld [vmem:[#allocation2 + $0x38] sm:$0xff]  ;;  %400 = vst.msk [vmem:[%s882_s3 + $0x10] sm:$0xf] %vm395_vm1, %v504_v47 }
  0xfd   :  { %v330_v53 = vld [vmem:[#allocation2 + $0x78] sm:$0xff]  ;;  %448 = vst.msk [vmem:[%s883_s4 + $0x20] sm:$0xff] %vm21_vm0, %v432_v48  ;;  %456 = vst.msk [vmem:[%s883_s4 + $0x60] sm:$0xff] %vm21_vm0, %v440_v50  ;;  %v507_v55 = vpack.c.bf16 %v322_v52, %v322_v52  ;;  %v435_v56 = vadd.f32 %v419_v43, %v322_v52 }
  0xfe   :  { %408 = vst.msk [vmem:[%s882_s3 + $0x30] sm:$0xf] %vm395_vm1, %v512_v49  ;;  %v515_v57 = vpack.c.bf16 %v330_v53, %v330_v53  ;;  %v443_v58 = vadd.f32 %v427_v46, %v330_v53 }
  0xff   :  { %v320_v59 = vld [vmem:[#allocation2 + $0x28] sm:$0xff]  ;;  %403 = vst.msk [vmem:[%s882_s3 + $0x1c] sm:$0xf] %vm395_vm1, %v507_v55 }
 0x100   :  { %v328_v60 = vld [vmem:[#allocation2 + $0x68] sm:$0xff]  ;;  %451 = vst.msk [vmem:[%s883_s4 + $0x38] sm:$0xff] %vm21_vm0, %v435_v56  ;;  %459 = vst.msk [vmem:[%s883_s4 + $0x78] sm:$0xff] %vm21_vm0, %v443_v58  ;;  %v505_v61 = vpack.c.bf16 %v320_v59, %v320_v59  ;;  %v433_v62 = vadd.f32 %v417_v51, %v320_v59 }
 0x101   :  { %411 = vst.msk [vmem:[%s882_s3 + $0x3c] sm:$0xf] %vm395_vm1, %v515_v57  ;;  %v513_v63 = vpack.c.bf16 %v328_v60, %v328_v60  ;;  %v441_v0 = vadd.f32 %v425_v54, %v328_v60 }
 0x102   :  { %401 = vst.msk [vmem:[%s882_s3 + $0x14] sm:$0xf] %vm395_vm1, %v505_v61 }
 0x103   :  { %449 = vst.msk [vmem:[%s883_s4 + $0x28] sm:$0xff] %vm21_vm0, %v433_v62  ;;  %457 = vst.msk [vmem:[%s883_s4 + $0x68] sm:$0xff] %vm21_vm0, %v441_v0 }
 0x104   :  { %409 = vst.msk [vmem:[%s882_s3 + $0x34] sm:$0xf] %vm395_vm1, %v513_v63 }

</bundles_post_ra>
